<compile_context>
chip_gen: v6e
topology: v6e:2x2x1
jax: 0.10.0
libtpu: 0.0.40
codegen_flags: <defaults>
</compile_context>

<pallas_src>
import jax
import jax.numpy as jnp
import numpy as np
from jax import lax
from jax.experimental import pallas as pl
from jax.experimental.pallas import tpu as pltpu

IM_SIZE = (5, 5)
IN_FEATURES = 3 * IM_SIZE[0] * IM_SIZE[1]   # 75
OUT_FEATURES = 1

LANES = 128            # f32 lane width
CHUNK_ROWS = 1024      # rows reduced per inner-loop step (= 128 f32 vregs live)
DEFAULT_TILE_ROWS = 16384   # rows DMA'd per grid step (~4.9 MB of real HBM data)


def _cdiv(a, b):
    return (a + b - 1) // b


def _round_up(x, m):
    return ((x + m - 1) // m) * m


def _linear_gemv_kernel(x_ref, w_ref, b_ref, o_ref):
    # x_ref: (TB, 75)       f32 VMEM  -- one batch tile (streamed over the grid)
    # w_ref: (1, 75)        f32 VMEM  -- resident weight row
    # b_ref: (1, 1)         f32 SMEM  -- scalar bias
    # o_ref: (TB//128, 128) f32 VMEM  -- lane-dense output slab
    feat = x_ref.shape[1]
    tb = x_ref.shape[0]
    grp = CHUNK_ROWS // LANES          # 8 output rows (one dense vreg) per chunk
    n_chunks = tb // CHUNK_ROWS        # TB is a multiple of CHUNK_ROWS by construction

    w = w_ref[...]                     # (1, 75): broadcasts over the chunk rows
    bias = b_ref[0, 0]                 # scalar from SMEM

    def chunk_body(j, carry):
        r0 = pl.multiple_of(j * CHUNK_ROWS, CHUNK_ROWS)
        xc = x_ref[pl.ds(r0, CHUNK_ROWS), :]                 # (1024, 75)
        prod = xc * w                                        # VPU elementwise
        # Tile-aligned split of the row dim (128 % 8 == 0 -> layout no-op),
        # then a lane reduce; Mosaic does the sublane->lane relayout once per
        # chunk so the store below is a single dense (8, 128) vreg store.
        y = jnp.sum(prod.reshape(grp, LANES, feat), axis=-1) + bias   # (8, 128)
        o0 = pl.multiple_of(j * grp, grp)
        o_ref[pl.ds(o0, grp), :] = y
        return carry

    lax.fori_loop(0, n_chunks, chunk_body, 0)


def model_min_class_forward(x_nchw, weight, bias, *, tile_rows=DEFAULT_TILE_ROWS):
    """x_nchw: (B, 3, 5, 5) f32; weight: (1, 75) f32 (torch layout); bias: (1,) f32."""
    B = x_nchw.shape[0]
    x_flat = x_nchw.reshape(B, IN_FEATURES).astype(jnp.float32)  # same as torch .view

    tile_rows = max(CHUNK_ROWS, _round_up(int(tile_rows), CHUNK_ROWS))

    # Tile sizing:
    #  * multiple of CHUNK_ROWS (so the in-kernel loop and the lane-dense
    #    output block shape stay static and (8,128)-aligned),
    #  * as large as possible (<= tile_rows) to amortize the ~0.35us/step cost,
    #  * capped so there are >= 2 (and usually an even number of) tiles for
    #    B > 128, keeping both v7x TensorCores fed via the "parallel" grid axis.
    pairs = _cdiv(B, 2 * tile_rows)
    tb = min(tile_rows, _round_up(_cdiv(B, 2 * pairs), CHUNK_ROWS))

    rows = B
    if B < tb:
        # Tiny-batch case only (< ~2K rows): zero-pad to one full tile.  This is
        # a few-hundred-KB copy at most; large batches are never padded -- the
        # ragged last tile is handled by Pallas' partial-block masking instead.
        x_flat = jnp.pad(x_flat, ((0, tb - B), (0, 0)))
        rows = tb

    num_tiles = _cdiv(rows, tb)
    groups_per_tile = tb // LANES              # multiple of 8
    out_rows = num_tiles * groups_per_tile

    w_row = weight.reshape(1, IN_FEATURES).astype(jnp.float32)   # (1, 75)
    b_sc = bias.reshape(1, 1).astype(jnp.float32)                # (1, 1) scalar

    out_dense = pl.pallas_call(
        _linear_gemv_kernel,
        out_shape=jax.ShapeDtypeStruct((out_rows, LANES), jnp.float32),
        grid_spec=pltpu.PrefetchScalarGridSpec(
            num_scalar_prefetch=0,
            grid=(num_tiles,),
            in_specs=[
                # Batch tile: streamed / double-buffered across the grid.
                # (For v5e, pipeline_mode=pl.Buffered(3) here if xprof shows
                #  exposed DMA at tile boundaries.)
                pl.BlockSpec((tb, IN_FEATURES), lambda i: (i, 0)),
                # Weight row: same block every step -> stays resident in VMEM.
                pl.BlockSpec((1, IN_FEATURES), lambda i: (0, 0)),
                # Bias: 4-byte scalar, whole array in SMEM (no VMEM DMA stream).
                pl.BlockSpec(memory_space=pltpu.MemorySpace.SMEM),
            ],
            # Lane-dense output: (tb/128, 128) per tile -> unmasked vst, ~128x
            # less output VMEM than a (tb, 1) block.
            out_specs=pl.BlockSpec((groups_per_tile, LANES), lambda i: (i, 0)),
        ),
        compiler_params=pltpu.CompilerParams(
            dimension_semantics=("parallel",),      # independent B tiles -> megacore on v7x
            # Real (lane-padded) need at tb=16384: ~16.2 MiB; 48 MiB leaves
            # headroom on v5e/v6e (128 MiB) and stays under v7x's 64 MiB/TC.
            vmem_limit_bytes=48 * 1024 * 1024,
        ),
    )(x_flat, w_row, b_sc)

    # Undo the lane-dense packing: output flat index (i*G + g)*128 + c is
    # exactly batch row i*tb + g*128 + c, so a flatten + slice recovers (B, 1).
    return out_dense.reshape(-1)[:B].reshape(B, OUT_FEATURES)


def init_params(key):
    """Deterministic Xavier-uniform init (matches init_weights_layer_linear:
    xavier_uniform with gain = 0.1 * calculate_gain('relu')), bias = 0."""
    gain = 0.1 * float(np.sqrt(2.0))  # 0.1 * relu gain
    fan_in, fan_out = IN_FEATURES, OUT_FEATURES
    limit = gain * np.sqrt(6.0 / (fan_in + fan_out))
    w = jax.random.uniform(key, (OUT_FEATURES, IN_FEATURES),
                           minval=-limit, maxval=limit, dtype=jnp.float32)
    b = jnp.zeros((OUT_FEATURES,), dtype=jnp.float32)
    return w, b


if __name__ == "__main__":
    key = jax.random.PRNGKey(0)
    k_w, k_x1, k_x2 = jax.random.split(key, 3)

    weight, bias = init_params(k_w)

    # --- small batch (typical usage of the module) ---
    B = 2
    x = jax.random.normal(k_x1, (B, 3, IM_SIZE[0], IM_SIZE[1]), dtype=jnp.float32)
    y = jax.block_until_ready(model_min_class_forward(x, weight, bias))
    y_ref = x.reshape(B, IN_FEATURES) @ weight.T + bias
    np.testing.assert_allclose(np.asarray(y), np.asarray(y_ref), rtol=1e-5, atol=1e-6)
    assert y.shape == (B, 1)

    # --- larger batch: exercises the multi-tile grid + ragged (unpadded) last tile ---
    B2 = 5000
    x2 = jax.random.normal(k_x2, (B2, 3, IM_SIZE[0], IM_SIZE[1]), dtype=jnp.float32)
    y2 = jax.block_until_ready(model_min_class_forward(x2, weight, bias))
    y2_ref = x2.reshape(B2, IN_FEATURES) @ weight.T + bias
    np.testing.assert_allclose(np.asarray(y2), np.asarray(y2_ref), rtol=1e-5, atol=1e-6)
    assert y2.shape == (B2, 1)

    print("KERNEL_OK")
</pallas_src>

<mosaic_0001>
module attributes {stable_mosaic.version = 11 : i64} {
  func.func @_linear_gemv_kernel(%arg0: i32, %arg1: memref<1024x75xf32, #tpu.memory_space<vmem>>, %arg2: memref<1x75xf32, #tpu.memory_space<vmem>>, %arg3: memref<1x1xf32, #tpu.memory_space<smem>>, %arg4: memref<8x128xf32, #tpu.memory_space<vmem>>) attributes {dimension_semantics = [#tpu.dimension_semantics<parallel>], iteration_bounds = array<i64: 1>, scalar_prefetch = 0 : i64, scratch_operands = 0 : i64, tpu.core_type = #tpu.core_type<tc>, window_params = [{transform_indices = @transform_0, window_bounds = array<i64: 1024, 75>}, {pipeline_mode = #tpu.pipeline_mode<synchronous>, transform_indices = @transform_1, window_bounds = array<i64: 1, 75>}, {transform_indices = @transform_2, window_bounds = array<i64: 1, 1>}, {transform_indices = @transform_3, window_bounds = array<i64: 8, 128>}]} {
    %c0 = arith.constant 0 : index
    %c0_0 = arith.constant 0 : index
    %0 = vector.load %arg2[%c0, %c0_0] : memref<1x75xf32, #tpu.memory_space<vmem>>, vector<1x75xf32>
    %c0_1 = arith.constant 0 : index
    %c0_2 = arith.constant 0 : index
    %1 = memref.load %arg3[%c0_1, %c0_2] : memref<1x1xf32, #tpu.memory_space<smem>>
    %c0_i32 = arith.constant 0 : i32
    %c1024_i32 = arith.constant 1024 : i32
    %2 = arith.muli %c0_i32, %c1024_i32 : i32
    %3 = tpu.assume_multiple %2, 1024 : i32
    %4 = arith.index_cast %3 : i32 to index
    %c0_3 = arith.constant 0 : index
    %5 = vector.load %arg1[%4, %c0_3] : memref<1024x75xf32, #tpu.memory_space<vmem>>, vector<1024x75xf32>
    %6 = vector.broadcast %0 : vector<1x75xf32> to vector<1024x75xf32>
    %7 = arith.mulf %5, %6 : vector<1024x75xf32>
    %8 = vector.shape_cast %7 : vector<1024x75xf32> to vector<8x128x75xf32>
    %cst = arith.constant dense<0.000000e+00> : vector<8x128xf32>
    %9 = vector.multi_reduction <add>, %8, %cst [2] : vector<8x128x75xf32> to vector<8x128xf32>
    %10 = vector.broadcast %1 : f32 to vector<8x128xf32>
    %11 = arith.addf %9, %10 : vector<8x128xf32>
    %c8_i32 = arith.constant 8 : i32
    %12 = arith.muli %c0_i32, %c8_i32 : i32
    %13 = tpu.assume_multiple %12, 8 : i32
    %14 = arith.index_cast %13 : i32 to index
    %c0_4 = arith.constant 0 : index
    %15 = vector.load %arg4[%14, %c0_4] : memref<8x128xf32, #tpu.memory_space<vmem>>, vector<8x128xf32>
    tpu.vector_store %arg4[%14, %c0_4], %11 {strides = array<i32>} : memref<8x128xf32, #tpu.memory_space<vmem>>, vector<8x128xf32>,
    %c1_i32 = arith.constant 1 : i32
    return
  }
  func.func @transform_0(%arg0: i32) -> (i32, i32) {
    %c0_i32 = arith.constant 0 : i32
    %c0_i32_0 = arith.constant 0 : i32
    return %arg0, %c0_i32 : i32, i32
  }
  func.func @transform_1(%arg0: i32) -> (i32, i32) {
    %c0_i32 = arith.constant 0 : i32
    %c0_i32_0 = arith.constant 0 : i32
    %c0_i32_1 = arith.constant 0 : i32
    return %c0_i32, %c0_i32_0 : i32, i32
  }
  func.func @transform_2(%arg0: i32) -> (i32, i32) {
    %c0_i32 = arith.constant 0 : i32
    %c0_i32_0 = arith.constant 0 : i32
    %c0_i32_1 = arith.constant 0 : i32
    return %c0_i32, %c0_i32_0 : i32, i32
  }
  func.func @transform_3(%arg0: i32) -> (i32, i32) {
    %c0_i32 = arith.constant 0 : i32
    %c0_i32_0 = arith.constant 0 : i32
    return %arg0, %c0_i32 : i32, i32
  }
}

</mosaic_0001>

<bundles_post_ra>
// kernel: tpu_custom_call.1
= control target key start
LH: loop header
LB: loop body
LE: loop exit
PB: predicated region body
PF: predicated region fallthrough
CT: control target
= control target key end

     0   :  { %vm280_vm0 = vcmask 613376   ;;  %s2798_s0 = inlined_call_operand.vmem [shape: f32[1024,75], index: 0, kind: input, shape index: {}]   ;;  %s2799_s1 = inlined_call_operand.vmem [shape: f32[1,75], index: 1, kind: input, shape index: {}]   ;;  %s2800_s2 = inlined_call_operand.<no memory space> [shape: f32[1,1], index: 2, kind: input, shape index: {}]   ;;  %s2801_s3 = inlined_call_operand.hbm [shape: f32[8,128], index: 3, kind: output, shape index: {}]  }
   0x1   :  { %v1665_v0 = vld [vmem:[%s2799_s1] ss:$0 sm:$0xff]  ;;  %v20_v1 = vld [vmem:[%s2798_s0 + $0x10] sm:$0xff]  ;;  %v21_v5 = vld [vmem:[%s2798_s0 + $0x18] sm:$0xff] }
   0x2   :  { %v18_v2 = vld [vmem:[%s2798_s0] sm:$0xff]  ;;  %v154_v3 = vmul.f32 %v1665_v0, %v20_v1  ;;  %v19_v6 = vld [vmem:[%s2798_s0 + $0x8] sm:$0xff]  ;;  %v155_v7 = vmul.f32 %v1665_v0, %v21_v5  ;;  %v25_v17 = vld [vmem:[%s2798_s0 + $0x38] sm:$0xff] }
   0x3   :  { %v152_v4 = vmul.f32 %v1665_v0, %v18_v2  ;;  %v153_v8 = vmul.f32 %v1665_v0, %v19_v6  ;;  %v23_v9 = vld [vmem:[%s2798_s0 + $0x28] sm:$0xff]  ;;  %v22_v10 = vld [vmem:[%s2798_s0 + $0x20] sm:$0xff]  ;;  %v24_v18 = vld [vmem:[%s2798_s0 + $0x30] sm:$0xff]  ;;  %v159_v21 = vmul.f32 %v1665_v0, %v25_v17 }
   0x4   :  { %v287_v11 = vsel %vm280_vm0, %v154_v3, 0.0  ;;  %v290_v13 = vsel %vm280_vm0, %v155_v7, 0.0  ;;  %v157_v15 = vmul.f32 %v1665_v0, %v23_v9  ;;  %v156_v16 = vmul.f32 %v1665_v0, %v22_v10  ;;  %v27_v23 = vld [vmem:[%s2798_s0 + $0x48] sm:$0xff]  ;;  %v26_v24 = vld [vmem:[%s2798_s0 + $0x40] sm:$0xff]  ;;  %v29_v29 = vld [vmem:[%s2798_s0 + $0x58] sm:$0xff] }
   0x5   :  { %v281_v12 = vsel %vm280_vm0, %v152_v4, 0.0  ;;  %288 = vadd.xlane.f32.xlu1 %v287_v11  ;;  %v284_v14 = vsel %vm280_vm0, %v153_v8, 0.0  ;;  %v158_v22 = vmul.f32 %v1665_v0, %v24_v18  ;;  %v302_v25 = vsel %vm280_vm0, %v159_v21, 0.0  ;;  %v28_v30 = vld [vmem:[%s2798_s0 + $0x50] sm:$0xff]  ;;  %v31_v35 = vld [vmem:[%s2798_s0 + $0x68] sm:$0xff]  ;;  %v30_v36 = vld [vmem:[%s2798_s0 + $0x60] sm:$0xff] }
   0x6   :  { %282 = vadd.xlane.f32.xlu0 %v281_v12  ;;  %v296_v19 = vsel %vm280_vm0, %v157_v15, 0.0  ;;  %v293_v20 = vsel %vm280_vm0, %v156_v16, 0.0  ;;  %v161_v27 = vmul.f32 %v1665_v0, %v27_v23  ;;  %v160_v28 = vmul.f32 %v1665_v0, %v26_v24  ;;  %v33_v41 = vld [vmem:[%s2798_s0 + $0x78] sm:$0xff]  ;;  %v32_v42 = vld [vmem:[%s2798_s0 + $0x70] sm:$0xff]  ;;  %v35_v47 = vld [vmem:[%s2798_s0 + $0x88] sm:$0xff] }
   0x7   :  { %v299_v26 = vsel %vm280_vm0, %v158_v22, 0.0  ;;  %v163_v33 = vmul.f32 %v1665_v0, %v29_v29  ;;  %v162_v34 = vmul.f32 %v1665_v0, %v28_v30  ;;  %v165_v39 = vmul.f32 %v1665_v0, %v31_v35  ;;  %v34_v48 = vld [vmem:[%s2798_s0 + $0x80] sm:$0xff] }
   0x8   :  { %v308_v31 = vsel %vm280_vm0, %v161_v27, 0.0  ;;  %v305_v32 = vsel %vm280_vm0, %v160_v28, 0.0  ;;  %v164_v40 = vmul.f32 %v1665_v0, %v30_v36  ;;  %v167_v45 = vmul.f32 %v1665_v0, %v33_v41 }
   0x9   :  { %291 = vadd.xlane.f32.xlu1 %v290_v13  ;;  %v314_v37 = vsel %vm280_vm0, %v163_v33, 0.0  ;;  %v311_v38 = vsel %vm280_vm0, %v162_v34, 0.0  ;;  %v320_v43 = vsel %vm280_vm0, %v165_v39, 0.0  ;;  %v166_v46 = vmul.f32 %v1665_v0, %v32_v42 }
   0xa   :  { %285 = vadd.xlane.f32.xlu0 %v284_v14  ;;  %v317_v44 = vsel %vm280_vm0, %v164_v40, 0.0 }
   0xd   :  { %297 = vadd.xlane.f32.xlu1 %v296_v19 }
   0xe   :  { %294 = vadd.xlane.f32.xlu0 %v293_v20 }
  0x11   :  { %303 = vadd.xlane.f32.xlu1 %v302_v25 }
  0x12   :  { %300 = vadd.xlane.f32.xlu0 %v299_v26 }
  0x15   :  { %309 = vadd.xlane.f32.xlu1 %v308_v31 }
  0x16   :  { %306 = vadd.xlane.f32.xlu0 %v305_v32 }
  0x19   :  { %315 = vadd.xlane.f32.xlu1 %v314_v37 }
  0x1a   :  { %312 = vadd.xlane.f32.xlu0 %v311_v38 }
  0x1b   :  { %9 = vsyncpa [#allocation4], 0  ;;  %v326_v49 = vsel %vm280_vm0, %v167_v45, 0.0  ;;  %v323_v50 = vsel %vm280_vm0, %v166_v46, 0.0  ;;  %v169_v51 = vmul.f32 %v1665_v0, %v35_v47  ;;  %v168_v52 = vmul.f32 %v1665_v0, %v34_v48  ;;  %v37_v53 = vld [vmem:[%s2798_s0 + $0x98] sm:$0xff]  ;;  %v36_v54 = vld [vmem:[%s2798_s0 + $0x90] sm:$0xff] }
  0x1c   :  { %v171_v57 = vmul.f32 %v1665_v0, %v37_v53  ;;  %v170_v58 = vmul.f32 %v1665_v0, %v36_v54  ;;  %v39_v59 = vld [vmem:[%s2798_s0 + $0xa8] sm:$0xff]  ;;  %v38_v60 = vld [vmem:[%s2798_s0 + $0xa0] sm:$0xff]  ;;  %v41_v2 = vld [vmem:[%s2798_s0 + $0xb8] sm:$0xff]  ;;  %vm933_vm1 = vcmask 130112   ;;  %vm940_vm2 = vcmask 195712  }
  0x1d   :  { %321 = vadd.xlane.f32.xlu1 %v320_v43  ;;  %v332_v55 = vsel %vm280_vm0, %v169_v51, 0.0  ;;  %v329_v56 = vsel %vm280_vm0, %v168_v52, 0.0  ;;  %v173_v63 = vmul.f32 %v1665_v0, %v39_v59  ;;  %v172_v1 = vmul.f32 %v1665_v0, %v38_v60  ;;  %v40_v3 = vld [vmem:[%s2798_s0 + $0xb0] sm:$0xff]  ;;  %v43_v8 = vld [vmem:[%s2798_s0 + $0xc8] sm:$0xff]  ;;  %v42_v9 = vld [vmem:[%s2798_s0 + $0xc0] sm:$0xff] }
  0x1e   :  { %318 = vadd.xlane.f32.xlu0 %v317_v44  ;;  %v338_v61 = vsel %vm280_vm0, %v171_v57, 0.0  ;;  %v335_v62 = vsel %vm280_vm0, %v170_v58, 0.0  ;;  %v175_v6 = vmul.f32 %v1665_v0, %v41_v2  ;;  %v174_v7 = vmul.f32 %v1665_v0, %v40_v3  ;;  %v45_v14 = vld [vmem:[%s2798_s0 + $0xd8] sm:$0xff]  ;;  %v44_v15 = vld [vmem:[%s2798_s0 + $0xd0] sm:$0xff]  ;;  %v47_v20 = vld [vmem:[%s2798_s0 + $0xe8] sm:$0xff] }
  0x1f   :  { %v344_v4 = vsel %vm280_vm0, %v173_v63, 0.0  ;;  %v341_v5 = vsel %vm280_vm0, %v172_v1, 0.0  ;;  %v177_v12 = vmul.f32 %v1665_v0, %v43_v8  ;;  %v176_v13 = vmul.f32 %v1665_v0, %v42_v9  ;;  %v46_v21 = vld [vmem:[%s2798_s0 + $0xe0] sm:$0xff]  ;;  %v49_v26 = vld [vmem:[%s2798_s0 + $0xf8] sm:$0xff]  ;;  %v48_v27 = vld [vmem:[%s2798_s0 + $0xf0] sm:$0xff] }
  0x20   :  { %v350_v10 = vsel %vm280_vm0, %v175_v6, 0.0  ;;  %v347_v11 = vsel %vm280_vm0, %v174_v7, 0.0  ;;  %v179_v18 = vmul.f32 %v1665_v0, %v45_v14  ;;  %v178_v19 = vmul.f32 %v1665_v0, %v44_v15  ;;  %v51_v32 = vld [vmem:[%s2798_s0 + $0x108] sm:$0xff]  ;;  %v50_v33 = vld [vmem:[%s2798_s0 + $0x100] sm:$0xff]  ;;  %v53_v38 = vld [vmem:[%s2798_s0 + $0x118] sm:$0xff] }
  0x21   :  { %327 = vadd.xlane.f32.xlu1 %v326_v49  ;;  %v356_v16 = vsel %vm280_vm0, %v177_v12, 0.0  ;;  %v353_v17 = vsel %vm280_vm0, %v176_v13, 0.0  ;;  %v181_v24 = vmul.f32 %v1665_v0, %v47_v20  ;;  %v180_v25 = vmul.f32 %v1665_v0, %v46_v21  ;;  %v52_v39 = vld [vmem:[%s2798_s0 + $0x110] sm:$0xff]  ;;  %v55_v44 = vld [vmem:[%s2798_s0 + $0x128] sm:$0xff]  ;;  %v54_v45 = vld [vmem:[%s2798_s0 + $0x120] sm:$0xff] }
  0x22   :  { %324 = vadd.xlane.f32.xlu0 %v323_v50  ;;  %v362_v22 = vsel %vm280_vm0, %v179_v18, 0.0  ;;  %v359_v23 = vsel %vm280_vm0, %v178_v19, 0.0  ;;  %v183_v30 = vmul.f32 %v1665_v0, %v49_v26  ;;  %v182_v31 = vmul.f32 %v1665_v0, %v48_v27  ;;  %v57_v50 = vld [vmem:[%s2798_s0 + $0x138] sm:$0xff]  ;;  %v56_v51 = vld [vmem:[%s2798_s0 + $0x130] sm:$0xff]  ;;  %v58_v57 = vld [vmem:[%s2798_s0 + $0x140] sm:$0xff] }
  0x23   :  { %v368_v28 = vsel %vm280_vm0, %v181_v24, 0.0  ;;  %v365_v29 = vsel %vm280_vm0, %v180_v25, 0.0  ;;  %v185_v36 = vmul.f32 %v1665_v0, %v51_v32  ;;  %v184_v37 = vmul.f32 %v1665_v0, %v50_v33  ;;  %v60_v63 = vld [vmem:[%s2798_s0 + $0x150] sm:$0xff]  ;;  %v62_v6 = vld [vmem:[%s2798_s0 + $0x160] sm:$0xff] }
  0x24   :  { %v374_v34 = vsel %vm280_vm0, %v183_v30, 0.0  ;;  %v371_v35 = vsel %vm280_vm0, %v182_v31, 0.0  ;;  %v187_v42 = vmul.f32 %v1665_v0, %v53_v38  ;;  %v186_v43 = vmul.f32 %v1665_v0, %v52_v39  ;;  %v64_v12 = vld [vmem:[%s2798_s0 + $0x170] sm:$0xff]  ;;  %v66_v18 = vld [vmem:[%s2798_s0 + $0x180] sm:$0xff] }
  0x25   :  { %333 = vadd.xlane.f32.xlu1 %v332_v55  ;;  %v380_v40 = vsel %vm280_vm0, %v185_v36, 0.0  ;;  %v377_v41 = vsel %vm280_vm0, %v184_v37, 0.0  ;;  %v189_v48 = vmul.f32 %v1665_v0, %v55_v44  ;;  %v188_v49 = vmul.f32 %v1665_v0, %v54_v45  ;;  %v68_v24 = vld [vmem:[%s2798_s0 + $0x190] sm:$0xff]  ;;  %v70_v30 = vld [vmem:[%s2798_s0 + $0x1a0] sm:$0xff] }
  0x26   :  { %330 = vadd.xlane.f32.xlu0 %v329_v56  ;;  %v386_v46 = vsel %vm280_vm0, %v187_v42, 0.0  ;;  %v383_v47 = vsel %vm280_vm0, %v186_v43, 0.0  ;;  %v191_v54 = vmul.f32 %v1665_v0, %v57_v50  ;;  %v190_v55 = vmul.f32 %v1665_v0, %v56_v51  ;;  %v59_v56 = vld [vmem:[%s2798_s0 + $0x148] sm:$0xff]  ;;  %v72_v36 = vld [vmem:[%s2798_s0 + $0x1b0] sm:$0xff]  ;;  %v74_v42 = vld [vmem:[%s2798_s0 + $0x1c0] sm:$0xff] }
  0x27   :  { %v392_v52 = vsel %vm280_vm0, %v189_v48, 0.0  ;;  %v389_v53 = vsel %vm280_vm0, %v188_v49, 0.0  ;;  %v193_v60 = vmul.f32 %v1665_v0, %v59_v56  ;;  %v76_v48 = vld [vmem:[%s2798_s0 + $0x1d0] sm:$0xff]  ;;  %vm947_vm3 = vcmask 261312  }
  0x28   :  { %v398_v58 = vsel %vm280_vm0, %v191_v54, 0.0  ;;  %v395_v59 = vsel %vm280_vm0, %v190_v55, 0.0  ;;  %v78_v54 = vld [vmem:[%s2798_s0 + $0x1e0] sm:$0xff]  ;;  %vm954_vm4 = vcmask 326912   ;;  %vm961_vm5 = vcmask 392512  }
  0x29   :  { %339 = vadd.xlane.f32.xlu1 %v338_v61  ;;  %v192_v61 = vmul.f32 %v1665_v0, %v58_v57  ;;  %v404_v1 = vsel %vm280_vm0, %v193_v60, 0.0  ;;  %v80_v60 = vld [vmem:[%s2798_s0 + $0x1f0] sm:$0xff]  ;;  %vm968_vm6 = vcmask 458112   ;;  %vm975_vm7 = vcmask 523712  }
  0x2a   :  { %336 = vadd.xlane.f32.xlu0 %v335_v62  ;;  %v61_v62 = vld [vmem:[%s2798_s0 + $0x158] sm:$0xff]  ;;  %vm982_vm8 = vcmask 589312   ;;  %vm989_vm9 = vcmask 654912   ;;  %vm996_vm10 = vcmask 720512   ;;  %vm2802_vm11 = vcmask 786112  }
  0x2b   :  { %v401_v2 = vsel %vm280_vm0, %v192_v61, 0.0  ;;  %v195_v3 = vmul.f32 %v1665_v0, %v61_v62  ;;  %vm1010_vm12 = vcmask 851712   ;;  %vm1017_vm13 = vcmask 917312  }
  0x2c   :  { %vm1024_vm14 = vcmask 982912   ;;  %vm1031_vm15 = vcmask 1048512  }
  0x2d   :  { %345 = vadd.xlane.f32.xlu1 %v344_v4  ;;  %v194_v4 = vmul.f32 %v1665_v0, %v60_v63  ;;  %v410_v7 = vsel %vm280_vm0, %v195_v3, 0.0  ;;  %v82_v3 = vld [vmem:[%s2798_s0 + $0x200] sm:$0xff] }
  0x2e   :  { %342 = vadd.xlane.f32.xlu0 %v341_v5  ;;  %v63_v5 = vld [vmem:[%s2798_s0 + $0x168] sm:$0xff] }
  0x2f   :  { %v407_v8 = vsel %vm280_vm0, %v194_v4, 0.0  ;;  %v197_v9 = vmul.f32 %v1665_v0, %v63_v5 }
  0x31   :  { %351 = vadd.xlane.f32.xlu1 %v350_v10  ;;  %v196_v10 = vmul.f32 %v1665_v0, %v62_v6  ;;  %v416_v13 = vsel %vm280_vm0, %v197_v9, 0.0  ;;  %v84_v9 = vld [vmem:[%s2798_s0 + $0x210] sm:$0xff] }
  0x32   :  { %348 = vadd.xlane.f32.xlu0 %v347_v11  ;;  %v65_v11 = vld [vmem:[%s2798_s0 + $0x178] sm:$0xff] }
  0x33   :  { %v413_v14 = vsel %vm280_vm0, %v196_v10, 0.0  ;;  %v199_v15 = vmul.f32 %v1665_v0, %v65_v11 }
  0x35   :  { %357 = vadd.xlane.f32.xlu1 %v356_v16  ;;  %v198_v16 = vmul.f32 %v1665_v0, %v64_v12  ;;  %v422_v19 = vsel %vm280_vm0, %v199_v15, 0.0  ;;  %v86_v15 = vld [vmem:[%s2798_s0 + $0x220] sm:$0xff] }
  0x36   :  { %354 = vadd.xlane.f32.xlu0 %v353_v17  ;;  %v67_v17 = vld [vmem:[%s2798_s0 + $0x188] sm:$0xff] }
  0x37   :  { %v419_v20 = vsel %vm280_vm0, %v198_v16, 0.0  ;;  %v201_v21 = vmul.f32 %v1665_v0, %v67_v17 }
  0x39   :  { %363 = vadd.xlane.f32.xlu1 %v362_v22  ;;  %v200_v22 = vmul.f32 %v1665_v0, %v66_v18  ;;  %v428_v25 = vsel %vm280_vm0, %v201_v21, 0.0  ;;  %v89_v21 = vld [vmem:[%s2798_s0 + $0x238] sm:$0xff] }
  0x3a   :  { %360 = vadd.xlane.f32.xlu0 %v359_v23  ;;  %v69_v23 = vld [vmem:[%s2798_s0 + $0x198] sm:$0xff] }
  0x3b   :  { %v425_v26 = vsel %vm280_vm0, %v200_v22, 0.0  ;;  %v203_v27 = vmul.f32 %v1665_v0, %v69_v23  ;;  %v88_v22 = vld [vmem:[%s2798_s0 + $0x230] sm:$0xff] }
  0x3d   :  { %369 = vadd.xlane.f32.xlu1 %v368_v28  ;;  %v202_v28 = vmul.f32 %v1665_v0, %v68_v24  ;;  %v434_v31 = vsel %vm280_vm0, %v203_v27, 0.0  ;;  %v222_v27 = vmul.f32 %v1665_v0, %v88_v22 }
  0x3e   :  { %366 = vadd.xlane.f32.xlu0 %v365_v29  ;;  %v71_v29 = vld [vmem:[%s2798_s0 + $0x1a8] sm:$0xff] }
  0x3f   :  { %v431_v32 = vsel %vm280_vm0, %v202_v28, 0.0  ;;  %v205_v33 = vmul.f32 %v1665_v0, %v71_v29  ;;  %v91_v28 = vld [vmem:[%s2798_s0 + $0x248] sm:$0xff]  ;;  %v90_v29 = vld [vmem:[%s2798_s0 + $0x240] sm:$0xff] }
  0x41   :  { %375 = vadd.xlane.f32.xlu1 %v374_v34  ;;  %v204_v34 = vmul.f32 %v1665_v0, %v70_v30  ;;  %v440_v37 = vsel %vm280_vm0, %v205_v33, 0.0 }
  0x42   :  { %372 = vadd.xlane.f32.xlu0 %v371_v35  ;;  %v73_v35 = vld [vmem:[%s2798_s0 + $0x1b8] sm:$0xff] }
  0x43   :  { %v437_v38 = vsel %vm280_vm0, %v204_v34, 0.0  ;;  %v207_v39 = vmul.f32 %v1665_v0, %v73_v35  ;;  %v225_v34 = vmul.f32 %v1665_v0, %v91_v28 }
  0x45   :  { %381 = vadd.xlane.f32.xlu1 %v380_v40  ;;  %v206_v40 = vmul.f32 %v1665_v0, %v72_v36  ;;  %v446_v43 = vsel %vm280_vm0, %v207_v39, 0.0  ;;  %v491_v39 = vsel %vm280_vm0, %v222_v27, 0.0 }
  0x46   :  { %378 = vadd.xlane.f32.xlu0 %v377_v41  ;;  %v75_v41 = vld [vmem:[%s2798_s0 + $0x1c8] sm:$0xff] }
  0x47   :  { %v443_v44 = vsel %vm280_vm0, %v206_v40, 0.0  ;;  %v209_v45 = vmul.f32 %v1665_v0, %v75_v41  ;;  %v224_v40 = vmul.f32 %v1665_v0, %v90_v29  ;;  %v93_v41 = vld [vmem:[%s2798_s0 + $0x258] sm:$0xff] }
  0x49   :  { %387 = vadd.xlane.f32.xlu1 %v386_v46  ;;  %v208_v46 = vmul.f32 %v1665_v0, %v74_v42  ;;  %v452_v49 = vsel %vm280_vm0, %v209_v45, 0.0  ;;  %v92_v42 = vld [vmem:[%s2798_s0 + $0x250] sm:$0xff] }
  0x4a   :  { %384 = vadd.xlane.f32.xlu0 %v383_v47  ;;  %v77_v47 = vld [vmem:[%s2798_s0 + $0x1d8] sm:$0xff] }
  0x4b   :  { %v449_v50 = vsel %vm280_vm0, %v208_v46, 0.0  ;;  %v211_v51 = vmul.f32 %v1665_v0, %v77_v47 }
  0x4d   :  { %393 = vadd.xlane.f32.xlu1 %v392_v52  ;;  %v210_v52 = vmul.f32 %v1665_v0, %v76_v48  ;;  %v458_v55 = vsel %vm280_vm0, %v211_v51, 0.0 }
  0x4e   :  { %390 = vadd.xlane.f32.xlu0 %v389_v53  ;;  %v79_v53 = vld [vmem:[%s2798_s0 + $0x1e8] sm:$0xff] }
  0x4f   :  { %v455_v56 = vsel %vm280_vm0, %v210_v52, 0.0  ;;  %v213_v57 = vmul.f32 %v1665_v0, %v79_v53 }
  0x51   :  { %399 = vadd.xlane.f32.xlu1 %v398_v58  ;;  %v212_v58 = vmul.f32 %v1665_v0, %v78_v54  ;;  %v464_v61 = vsel %vm280_vm0, %v213_v57, 0.0 }
  0x52   :  { %396 = vadd.xlane.f32.xlu0 %v395_v59  ;;  %v81_v59 = vld [vmem:[%s2798_s0 + $0x1f8] sm:$0xff] }
  0x53   :  { %v461_v62 = vsel %vm280_vm0, %v212_v58, 0.0  ;;  %v215_v63 = vmul.f32 %v1665_v0, %v81_v59  ;;  %v95_v59 = vld [vmem:[%s2798_s0 + $0x268] sm:$0xff] }
  0x55   :  { %405 = vadd.xlane.f32.xlu1 %v404_v1  ;;  %v214_v1 = vmul.f32 %v1665_v0, %v80_v60  ;;  %v470_v4 = vsel %vm280_vm0, %v215_v63, 0.0  ;;  %v94_v60 = vld [vmem:[%s2798_s0 + $0x260] sm:$0xff] }
  0x56   :  { %402 = vadd.xlane.f32.xlu0 %v401_v2  ;;  %v83_v2 = vld [vmem:[%s2798_s0 + $0x208] sm:$0xff] }
  0x57   :  { %v467_v5 = vsel %vm280_vm0, %v214_v1, 0.0  ;;  %v217_v6 = vmul.f32 %v1665_v0, %v83_v2 }
  0x59   :  { %411 = vadd.xlane.f32.xlu1 %v410_v7  ;;  %v216_v7 = vmul.f32 %v1665_v0, %v82_v3  ;;  %v476_v10 = vsel %vm280_vm0, %v217_v6, 0.0 }
  0x5a   :  { %408 = vadd.xlane.f32.xlu0 %v407_v8  ;;  %v85_v8 = vld [vmem:[%s2798_s0 + $0x218] sm:$0xff] }
  0x5b   :  { %v473_v11 = vsel %vm280_vm0, %v216_v7, 0.0  ;;  %v219_v12 = vmul.f32 %v1665_v0, %v85_v8 }
  0x5d   :  { %417 = vadd.xlane.f32.xlu1 %v416_v13  ;;  %v218_v13 = vmul.f32 %v1665_v0, %v84_v9  ;;  %v482_v17 = vsel %vm280_vm0, %v219_v12, 0.0 }
  0x5e   :  { %414 = vadd.xlane.f32.xlu0 %v413_v14  ;;  %v87_v14 = vld [vmem:[%s2798_s0 + $0x228] sm:$0xff] }
  0x5f   :  { %v221_v16 = vmul.f32 %v1665_v0, %v87_v14  ;;  %v479_v18 = vsel %vm280_vm0, %v218_v13, 0.0 }
  0x61   :  { %423 = vadd.xlane.f32.xlu1 %v422_v19  ;;  %v220_v19 = vmul.f32 %v1665_v0, %v86_v15  ;;  %v488_v23 = vsel %vm280_vm0, %v221_v16, 0.0  ;;  %v97_v15 = vld [vmem:[%s2798_s0 + $0x278] sm:$0xff]  ;;  %v96_v16 = vld [vmem:[%s2798_s0 + $0x270] sm:$0xff] }
  0x62   :  { %420 = vadd.xlane.f32.xlu0 %v419_v20  ;;  %v922_v20 = vlaneseq }
  0x63   :  { %v485_v24 = vsel %vm280_vm0, %v220_v19, 0.0 }
  0x64   :  { %v2033_v30 = vshrl.u32 %v922_v20, 7 }
  0x65   :  { %429 = vadd.xlane.f32.xlu1 %v428_v25  ;;  %v2023_v25 = vand.u32 127, %v922_v20 }
  0x66   :  { %426 = vadd.xlane.f32.xlu0 %v425_v26  ;;  %v223_v26 = vmul.f32 %v1665_v0, %v89_v21 }
  0x67   :  { %v928_v33 = vadd.s32 4294967288, %v2023_v25  ;;  %v935_v35 = vadd.s32 4294967280, %v2023_v25  ;;  %v956_v45 = vadd.s32 4294967256, %v2023_v25  ;;  %v949_v46 = vadd.s32 4294967264, %v2023_v25 }
  0x68   :  { %v970_v63 = vadd.s32 4294967240, %v2023_v25  ;;  %v963_v1 = vadd.s32 4294967248, %v2023_v25  ;;  %v984_v20 = vadd.s32 4294967224, %v2023_v25 }
  0x69   :  { %435 = vadd.xlane.f32.xlu1 %v434_v31  ;;  %v942_v31 = vadd.s32 4294967272, %v2023_v25  ;;  %v2064_v48 = vsub.s32 %v928_v33, %v2033_v30  ;;  %v2069_v51 = vsub.s32 %v935_v35, %v2033_v30  ;;  %v230_v33 = vmul.f32 %v1665_v0, %v96_v16  ;;  %v101_v16 = vld [vmem:[%s2798_s0 + $0x298] sm:$0xff] }
  0x6a   :  { %432 = vadd.xlane.f32.xlu0 %v431_v32  ;;  %v2039_v32 = vstv %s2800_s2  ;;  %v2112_v19 = vsub.s32 %v963_v1, %v2033_v30 }
  0x6d   :  { %441 = vadd.xlane.f32.xlu1 %v440_v37 }
  0x6e   :  { %438 = vadd.xlane.f32.xlu0 %v437_v38  ;;  %v494_v38 = vsel %vm280_vm0, %v223_v26, 0.0 }
  0x71   :  { %447 = vadd.xlane.f32.xlu1 %v446_v43  ;;  %v2055_v43 = vsub.s32 %v2023_v25, %v2033_v30 }
  0x72   :  { %444 = vadd.xlane.f32.xlu0 %v443_v44  ;;  %v2058_v44 = vsub.s32 %v942_v31, %v2033_v30  ;;  %v231_v31 = vmul.f32 %v1665_v0, %v97_v15 }
  0x75   :  { %453 = vadd.xlane.f32.xlu1 %v452_v49  ;;  %v500_v49 = vsel %vm280_vm0, %v225_v34, 0.0 }
  0x76   :  { %450 = vadd.xlane.f32.xlu0 %v449_v50  ;;  %v227_v50 = vmul.f32 %v1665_v0, %v93_v41  ;;  %v998_v41 = vadd.s32 4294967208, %v2023_v25 }
  0x78   :  { %v2158_v1 = vsub.s32 %v998_v41, %v2033_v30 }
  0x79   :  { %459 = vadd.xlane.f32.xlu1 %v458_v55  ;;  %v497_v55 = vsel %vm280_vm0, %v224_v40, 0.0  ;;  %v2134_v40 = vsub.s32 %v984_v20, %v2033_v30 }
  0x7a   :  { %456 = vadd.xlane.f32.xlu0 %v455_v56  ;;  %v226_v56 = vmul.f32 %v1665_v0, %v92_v42 }
  0x7c   :  { %v503_v9 = vsel %vm280_vm0, %v226_v56, 0.0 }
  0x7d   :  { %465 = vadd.xlane.f32.xlu1 %v464_v61  ;;  %v2083_v61 = vsub.s32 %v956_v45, %v2033_v30 }
  0x7e   :  { %462 = vadd.xlane.f32.xlu0 %v461_v62  ;;  %v2086_v62 = vsub.s32 %v949_v46, %v2033_v30 }
  0x81   :  { %471 = vadd.xlane.f32.xlu1 %v470_v4 }
  0x82   :  { %468 = vadd.xlane.f32.xlu0 %v467_v5  ;;  %v506_v5 = vsel %vm280_vm0, %v227_v50, 0.0 }
  0x85   :  { %477 = vadd.xlane.f32.xlu1 %v476_v10  ;;  %v229_v10 = vmul.f32 %v1665_v0, %v95_v59  ;;  %v114_v59 = vld [vmem:[%s2798_s0 + $0x300] sm:$0xff] }
  0x86   :  { %474 = vadd.xlane.f32.xlu0 %v473_v11  ;;  %v228_v11 = vmul.f32 %v1665_v0, %v94_v60  ;;  %v100_v60 = vld [vmem:[%s2798_s0 + $0x290] sm:$0xff] }
  0x87   :  { %v512_v28 = vsel %vm280_vm0, %v229_v10, 0.0 }
  0x88   :  { %v509_v29 = vsel %vm280_vm0, %v228_v11, 0.0  ;;  %v248_v11 = vmul.f32 %v1665_v0, %v114_v59 }
  0x89   :  { %483 = vadd.xlane.f32.xlu1 %v482_v17 }
  0x8a   :  { %480 = vadd.xlane.f32.xlu0 %v479_v18  ;;  %v2109_v18 = vsub.s32 %v970_v63, %v2033_v30 }
  0x8d   :  { %489 = vadd.xlane.f32.xlu1 %v488_v23 }
  0x8e   :  { %486 = vadd.xlane.f32.xlu0 %v485_v24  ;;  %v289_v36 = vpop.xlane.xlu1 %288  ;;  %v977_v24 = vadd.s32 4294967232, %v2023_v25 }
  0x8f   :  { %v283_v37 = vpop.xlane.xlu0 %282  ;;  %v668_v52 = vadd.f32 %v2039_v32, %v289_v36 }
  0x90   :  { %v666_v47 = vadd.f32 %v2039_v32, %v283_v37  ;;  %v99_v37 = vld [vmem:[%s2798_s0 + $0x288] sm:$0xff]  ;;  %v2140_v46 = vsub.s32 %v977_v24, %v2033_v30 }
  0x91   :  { %495 = vadd.xlane.f32.xlu1 %v494_v38  ;;  %v939_v6 = vrot.slane %v668_v52, %v2069_v51  ;;  %v98_v38 = vld [vmem:[%s2798_s0 + $0x280] sm:$0xff]  ;;  %v518_v52 = vsel %vm280_vm0, %v231_v31, 0.0  ;;  %v569_v31 = vsel %vm280_vm0, %v248_v11, 0.0 }
  0x92   :  { %492 = vadd.xlane.f32.xlu0 %v491_v39  ;;  %v292_v53 = vpop.xlane.xlu1 %291  ;;  %v927_v2 = vrot.slane %v666_v47, %v2055_v43  ;;  %v991_v47 = vadd.s32 4294967216, %v2023_v25 }
  0x93   :  { %v286_v54 = vpop.xlane.xlu0 %285  ;;  %v669_v57 = vadd.f32 %v2039_v32, %v292_v53  ;;  %v515_v53 = vsel %vm280_vm0, %v230_v33, 0.0 }
  0x94   :  { %v667_v58 = vadd.f32 %v2039_v32, %v286_v54  ;;  %v233_v54 = vmul.f32 %v1665_v0, %v99_v37 }
  0x95   :  { %v946_v3 = vrot.slane %v669_v57, %v2058_v44  ;;  %501 = vadd.xlane.f32.xlu1 %v500_v49 }
  0x96   :  { %v932_v4 = vrot.slane %v667_v58, %v2064_v48  ;;  %498 = vadd.xlane.f32.xlu0 %v497_v55  ;;  %v298_v7 = vpop.xlane.xlu1 %297  ;;  %v232_v55 = vmul.f32 %v1665_v0, %v98_v38 }
  0x97   :  { %v295_v8 = vpop.xlane.xlu0 %294  ;;  %v671_v13 = vadd.f32 %v2039_v32, %v298_v7 }
  0x98   :  { %v934_v12 = vsel %vm933_vm1, %v932_v4, %v927_v2  ;;  %v670_v14 = vadd.f32 %v2039_v32, %v295_v8  ;;  %v1012_v2 = vadd.s32 4294967192, %v2023_v25  ;;  %v521_v10 = vsel %vm280_vm0, %v232_v55, 0.0 }
  0x99   :  { %v941_v17 = vsel %vm940_vm2, %v939_v6, %v934_v12  ;;  %v960_v21 = vrot.slane %v671_v13, %v2083_v61  ;;  %507 = vadd.xlane.f32.xlu1 %v506_v5  ;;  %v2164_v5 = vsub.s32 %v991_v47, %v2033_v30  ;;  %v1005_v6 = vadd.s32 4294967200, %v2023_v25 }
  0x9a   :  { %v948_v22 = vsel %vm947_vm3, %v946_v3, %v941_v17  ;;  %v953_v23 = vrot.slane %v670_v14, %v2086_v62  ;;  %504 = vadd.xlane.f32.xlu0 %v503_v9  ;;  %v304_v26 = vpop.xlane.xlu1 %303  ;;  %v524_v9 = vsel %vm280_vm0, %v233_v54, 0.0  ;;  %v234_v12 = vmul.f32 %v1665_v0, %v100_v60  ;;  %v115_v17 = vld [vmem:[%s2798_s0 + $0x308] sm:$0xff] }
  0x9b   :  { %v301_v27 = vpop.xlane.xlu0 %300  ;;  %v673_v35 = vadd.f32 %v2039_v32, %v304_v26  ;;  %v2188_v26 = vsub.s32 %v1005_v6, %v2033_v30  ;;  %v131_v60 = vld [vmem:[%s2798_s0 + $0x388] sm:$0xff] }
  0x9c   :  { %v955_v34 = vsel %vm954_vm4, %v953_v23, %v948_v22  ;;  %v672_v36 = vadd.f32 %v2039_v32, %v301_v27  ;;  %v1026_v22 = vadd.s32 4294967176, %v2023_v25  ;;  %v1019_v27 = vadd.s32 4294967184, %v2023_v25  ;;  %v130_v25 = vld [vmem:[%s2798_s0 + $0x380] sm:$0xff] }
  0x9d   :  { %v962_v39 = vsel %vm961_vm5, %v960_v21, %v955_v34  ;;  %v974_v42 = vrot.slane %v673_v35, %v2109_v18  ;;  %513 = vadd.xlane.f32.xlu1 %v512_v28  ;;  %v2182_v21 = vsub.s32 %v1012_v2, %v2033_v30  ;;  %v527_v33 = vsel %vm280_vm0, %v234_v12, 0.0 }
  0x9e   :  { %v967_v45 = vrot.slane %v672_v36, %v2112_v19  ;;  %510 = vadd.xlane.f32.xlu0 %v509_v29  ;;  %v310_v49 = vpop.xlane.xlu1 %309  ;;  %v235_v34 = vmul.f32 %v1665_v0, %v101_v16  ;;  %v249_v35 = vmul.f32 %v1665_v0, %v115_v17  ;;  %v264_v55 = vmul.f32 %v1665_v0, %v130_v25 }
  0x9f   :  { %v307_v50 = vpop.xlane.xlu0 %306  ;;  %v675_v57 = vadd.f32 %v2039_v32, %v310_v49  ;;  %v2211_v49 = vsub.s32 %v1019_v27, %v2033_v30 }
  0xa0   :  { %v969_v56 = vsel %vm968_vm6, %v967_v45, %v962_v39  ;;  %v674_v58 = vadd.f32 %v2039_v32, %v307_v50  ;;  %v116_v39 = vld [vmem:[%s2798_s0 + $0x310] sm:$0xff]  ;;  %v572_v54 = vsel %vm280_vm0, %v249_v35, 0.0  ;;  %v118_v35 = vld [vmem:[%s2798_s0 + $0x320] sm:$0xff] }
  0xa1   :  { %v976_v63 = vsel %vm975_vm7, %v974_v42, %v969_v56  ;;  %v988_v3 = vrot.slane %v675_v57, %v2134_v40  ;;  %519 = vadd.xlane.f32.xlu1 %v518_v52  ;;  %v2206_v42 = vsub.s32 %v1026_v22, %v2033_v30  ;;  %v250_v56 = vmul.f32 %v1665_v0, %v116_v39  ;;  %v102_v30 = vld [vmem:[%s2798_s0 + $0x2a0] sm:$0xff] }
  0xa2   :  { %v981_v4 = vrot.slane %v674_v58, %v2140_v46  ;;  %516 = vadd.xlane.f32.xlu0 %v515_v53  ;;  %v316_v7 = vpop.xlane.xlu1 %315  ;;  %v530_v53 = vsel %vm280_vm0, %v235_v34, 0.0 }
  0xa3   :  { %v313_v8 = vpop.xlane.xlu0 %312  ;;  %v677_v14 = vadd.f32 %v2039_v32, %v316_v7  ;;  %v617_v7 = vsel %vm280_vm0, %v264_v55, 0.0  ;;  %v104_v55 = vld [vmem:[%s2798_s0 + $0x2b0] sm:$0xff] }
  0xa4   :  { %v983_v13 = vsel %vm982_vm8, %v981_v4, %v976_v63  ;;  %v676_v15 = vadd.f32 %v2039_v32, %v313_v8  ;;  %v575_v8 = vsel %vm280_vm0, %v250_v56, 0.0  ;;  %v133_v56 = vld [vmem:[%s2798_s0 + $0x398] sm:$0xff] }
  0xa5   :  { %v990_v20 = vsel %vm989_vm9, %v988_v3, %v983_v13  ;;  %v1002_v23 = vrot.slane %v677_v14, %v2158_v1  ;;  %525 = vadd.xlane.f32.xlu1 %v524_v9  ;;  %v236_v9 = vmul.f32 %v1665_v0, %v102_v30  ;;  %v132_v14 = vld [vmem:[%s2798_s0 + $0x390] sm:$0xff] }
  0xa6   :  { %v995_v24 = vrot.slane %v676_v15, %v2164_v5  ;;  %522 = vadd.xlane.f32.xlu0 %v521_v10  ;;  %v322_v28 = vpop.xlane.xlu1 %321  ;;  %v265_v10 = vmul.f32 %v1665_v0, %v131_v60  ;;  %v117_v15 = vld [vmem:[%s2798_s0 + $0x318] sm:$0xff] }
  0xa7   :  { %v319_v29 = vpop.xlane.xlu0 %318  ;;  %v679_v37 = vadd.f32 %v2039_v32, %v322_v28  ;;  %v266_v28 = vmul.f32 %v1665_v0, %v132_v14 }
  0xa8   :  { %v997_v36 = vsel %vm996_vm10, %v995_v24, %v990_v20  ;;  %v678_v38 = vadd.f32 %v2039_v32, %v319_v29  ;;  %v533_v24 = vsel %vm280_vm0, %v236_v9, 0.0  ;;  %v620_v27 = vsel %vm280_vm0, %v265_v10, 0.0  ;;  %v134_v9 = vld [vmem:[%s2798_s0 + $0x3a0] sm:$0xff]  ;;  %v119_v10 = vld [vmem:[%s2798_s0 + $0x328] sm:$0xff] }
  0xa9   :  { %v1004_v41 = vsel %vm2802_vm11, %v1002_v23, %v997_v36  ;;  %v1016_v45 = vrot.slane %v679_v37, %v2182_v21  ;;  %570 = vadd.xlane.f32.xlu1 %v569_v31  ;;  %v251_v29 = vmul.f32 %v1665_v0, %v117_v15  ;;  %v103_v36 = vld [vmem:[%s2798_s0 + $0x2a8] sm:$0xff] }
  0xaa   :  { %v1009_v47 = vrot.slane %v678_v38, %v2188_v26  ;;  %528 = vadd.xlane.f32.xlu0 %v527_v33  ;;  %v328_v50 = vpop.xlane.xlu1 %327 }
  0xab   :  { %v325_v52 = vpop.xlane.xlu0 %324  ;;  %v681_v58 = vadd.f32 %v2039_v32, %v328_v50  ;;  %v237_v50 = vmul.f32 %v1665_v0, %v103_v36 }
  0xac   :  { %v1011_v57 = vsel %vm1010_vm12, %v1009_v47, %v1004_v41  ;;  %v680_v59 = vadd.f32 %v2039_v32, %v325_v52  ;;  %v623_v41 = vsel %vm280_vm0, %v266_v28, 0.0  ;;  %v252_v47 = vmul.f32 %v1665_v0, %v118_v35 }
  0xad   :  { %v1018_v63 = vsel %vm1017_vm13, %v1016_v45, %v1011_v57  ;;  %v1030_v2 = vrot.slane %v681_v58, %v2206_v42  ;;  %531 = vadd.xlane.f32.xlu1 %v530_v53  ;;  %v578_v45 = vsel %vm280_vm0, %v251_v29, 0.0  ;;  %v120_v29 = vld [vmem:[%s2798_s0 + $0x330] sm:$0xff] }
  0xae   :  { %v1023_v3 = vrot.slane %v680_v59, %v2211_v49  ;;  %573 = vadd.xlane.f32.xlu0 %v572_v54  ;;  %v334_v4 = vpop.xlane.xlu1 %333  ;;  %v581_v60 = vsel %vm280_vm0, %v252_v47, 0.0 }
  0xaf   :  { %v331_v6 = vpop.xlane.xlu0 %330  ;;  %v683_v12 = vadd.f32 %v2039_v32, %v334_v4 }
  0xb0   :  { %v1025_v11 = vsel %vm1024_vm14, %v1023_v3, %v1018_v63  ;;  %v682_v13 = vadd.f32 %v2039_v32, %v331_v6  ;;  %v536_v63 = vsel %vm280_vm0, %v237_v50, 0.0 }
  0xb1   :  { %v2243_v16 = vsel %vm1031_vm15, %v1030_v2, %v1025_v11  ;;  %v1040_v17 = vrot.slane %v683_v12, %v2064_v48  ;;  %618 = vadd.xlane.f32.xlu1 %v617_v7  ;;  %v2283_v2 = vld [vmem:[%s2799_s1] ss:$0 sm:$0xff] }
  0xb2   :  { %v1036_v20 = vrot.slane %v682_v13, %v2055_v43  ;;  %576 = vadd.xlane.f32.xlu0 %v575_v8  ;;  %v340_v22 = vpop.xlane.xlu1 %339  ;;  %v238_v3 = vmul.f32 %v2283_v2, %v104_v55  ;;  %v267_v4 = vmul.f32 %v2283_v2, %v133_v56 }
  0xb3   :  { %v337_v23 = vpop.xlane.xlu0 %336  ;;  %v685_v33 = vadd.f32 %v2039_v32, %v340_v22  ;;  %v268_v22 = vmul.f32 %v2283_v2, %v134_v9 }
  0xb4   :  { %v1041_v31 = vsel %vm933_vm1, %v1040_v17, %v1036_v20  ;;  %v684_v34 = vadd.f32 %v2039_v32, %v337_v23  ;;  %v539_v17 = vsel %vm280_vm0, %v238_v3, 0.0  ;;  %v626_v20 = vsel %vm280_vm0, %v267_v4, 0.0 }
  0xb5   :  { %v1050_v37 = vrot.slane %v685_v33, %v2058_v44  ;;  %534 = vadd.xlane.f32.xlu1 %v533_v24  ;;  %v253_v23 = vmul.f32 %v2283_v2, %v119_v10 }
  0xb6   :  { %v1045_v38 = vrot.slane %v684_v34, %v2069_v51  ;;  %621 = vadd.xlane.f32.xlu0 %v620_v27  ;;  %v346_v25 = vpop.xlane.xlu1 %345 }
  0xb7   :  { %v343_v39 = vpop.xlane.xlu0 %342  ;;  %v687_v53 = vadd.f32 %v2039_v32, %v346_v25  ;;  %v584_v25 = vsel %vm280_vm0, %v253_v23, 0.0 }
  0xb8   :  { %v1046_v52 = vsel %vm940_vm2, %v1045_v38, %v1041_v31  ;;  %v686_v54 = vadd.f32 %v2039_v32, %v343_v39  ;;  %v105_v31 = vld [vmem:[%s2798_s0 + $0x2b8] sm:$0xff]  ;;  %v629_v38 = vsel %vm280_vm0, %v268_v22, 0.0  ;;  %v254_v39 = vmul.f32 %v2283_v2, %v120_v29 }
  0xb9   :  { %v1051_v57 = vsel %vm947_vm3, %v1050_v37, %v1046_v52  ;;  %v1060_v58 = vrot.slane %v687_v53, %v2083_v61  ;;  %624 = vadd.xlane.f32.xlu1 %v623_v41  ;;  %v239_v41 = vmul.f32 %v2283_v2, %v105_v31  ;;  %v106_v52 = vld [vmem:[%s2798_s0 + $0x2c0] sm:$0xff]  ;;  %v135_v53 = vld [vmem:[%s2798_s0 + $0x3a8] sm:$0xff] }
  0xba   :  { %v1055_v0 = vrot.slane %v686_v54, %v2086_v62  ;;  %579 = vadd.xlane.f32.xlu0 %v578_v45  ;;  %v352_v59 = vpop.xlane.xlu1 %351 }
  0xbb   :  { %v349_v30 = vpop.xlane.xlu0 %348  ;;  %v689_v7 = vadd.f32 %v2039_v32, %v352_v59  ;;  %v542_v59 = vsel %vm280_vm0, %v239_v41, 0.0 }
  0xbc   :  { %v1056_v6 = vsel %vm954_vm4, %v1055_v0, %v1051_v57  ;;  %v688_v8 = vadd.f32 %v2039_v32, %v349_v30  ;;  %v587_v0 = vsel %vm280_vm0, %v254_v39, 0.0  ;;  %v240_v30 = vmul.f32 %v2283_v2, %v106_v52 }
  0xbd   :  { %v1061_v11 = vsel %vm961_vm5, %v1060_v58, %v1056_v6  ;;  %v1070_v12 = vrot.slane %v689_v7, %v2109_v18  ;;  %582 = vadd.xlane.f32.xlu1 %v581_v60  ;;  %v269_v60 = vmul.f32 %v2283_v2, %v135_v53  ;;  %v136_v6 = vld [vmem:[%s2798_s0 + $0x3b0] sm:$0xff]  ;;  %v121_v7 = vld [vmem:[%s2798_s0 + $0x338] sm:$0xff] }
  0xbe   :  { %v1065_v13 = vrot.slane %v688_v8, %v2112_v19  ;;  %537 = vadd.xlane.f32.xlu0 %v536_v63  ;;  %v358_v14 = vpop.xlane.xlu1 %357 }
  0xbf   :  { %v355_v15 = vpop.xlane.xlu0 %354  ;;  %v691_v27 = vadd.f32 %v2039_v32, %v358_v14  ;;  %v632_v14 = vsel %vm280_vm0, %v269_v60, 0.0 }
  0xc0   :  { %v1066_v24 = vsel %vm968_vm6, %v1065_v13, %v1061_v11  ;;  %v690_v28 = vadd.f32 %v2039_v32, %v355_v15  ;;  %v545_v13 = vsel %vm280_vm0, %v240_v30, 0.0  ;;  %v270_v15 = vmul.f32 %v2283_v2, %v136_v6 }
  0xc1   :  { %v1071_v33 = vsel %vm975_vm7, %v1070_v12, %v1066_v24  ;;  %v1080_v34 = vrot.slane %v691_v27, %v2134_v40  ;;  %540 = vadd.xlane.f32.xlu1 %v539_v17  ;;  %v255_v17 = vmul.f32 %v2283_v2, %v121_v7  ;;  %v122_v24 = vld [vmem:[%s2798_s0 + $0x340] sm:$0xff]  ;;  %v107_v27 = vld [vmem:[%s2798_s0 + $0x2c8] sm:$0xff] }
  0xc2   :  { %v1075_v35 = vrot.slane %v690_v28, %v2140_v46  ;;  %627 = vadd.xlane.f32.xlu0 %v626_v20  ;;  %v364_v36 = vpop.xlane.xlu1 %363 }
  0xc3   :  { %v361_v37 = vpop.xlane.xlu0 %360  ;;  %v693_v47 = vadd.f32 %v2039_v32, %v364_v36  ;;  %v590_v36 = vsel %vm280_vm0, %v255_v17, 0.0  ;;  %v124_v17 = vld [vmem:[%s2798_s0 + $0x350] sm:$0xff] }
  0xc4   :  { %v1076_v45 = vsel %vm982_vm8, %v1075_v35, %v1071_v33  ;;  %v692_v50 = vadd.f32 %v2039_v32, %v361_v37  ;;  %v635_v35 = vsel %vm280_vm0, %v270_v15, 0.0  ;;  %v256_v37 = vmul.f32 %v2283_v2, %v122_v24 }
  0xc5   :  { %v1081_v54 = vsel %vm989_vm9, %v1080_v34, %v1076_v45  ;;  %v1090_v55 = vrot.slane %v693_v47, %v2158_v1  ;;  %630 = vadd.xlane.f32.xlu1 %v629_v38  ;;  %v241_v38 = vmul.f32 %v2283_v2, %v107_v27  ;;  %v108_v45 = vld [vmem:[%s2798_s0 + $0x2d0] sm:$0xff]  ;;  %v137_v47 = vld [vmem:[%s2798_s0 + $0x3b8] sm:$0xff] }
  0xc6   :  { %v1085_v56 = vrot.slane %v692_v50, %v2164_v5  ;;  %585 = vadd.xlane.f32.xlu0 %v584_v25  ;;  %v370_v57 = vpop.xlane.xlu1 %369 }
  0xc7   :  { %v367_v58 = vpop.xlane.xlu0 %366  ;;  %v695_v3 = vadd.f32 %v2039_v32, %v370_v57  ;;  %v593_v57 = vsel %vm280_vm0, %v256_v37, 0.0 }
  0xc8   :  { %v1086_v63 = vsel %vm996_vm10, %v1085_v56, %v1081_v54  ;;  %v694_v4 = vadd.f32 %v2039_v32, %v367_v58  ;;  %v548_v58 = vsel %vm280_vm0, %v241_v38, 0.0  ;;  %v110_v38 = vld [vmem:[%s2798_s0 + $0x2e0] sm:$0xff] }
  0xc9   :  { %v1091_v8 = vsel %vm2802_vm11, %v1090_v55, %v1086_v63  ;;  %v1100_v9 = vrot.slane %v695_v3, %v2182_v21  ;;  %588 = vadd.xlane.f32.xlu1 %v587_v0  ;;  %vm1586_vm11 = vcmask 1041409   ;;  %v242_v0 = vmul.f32 %v2283_v2, %v108_v45  ;;  %v138_v63 = vld [vmem:[%s2798_s0 + $0x3c0] sm:$0xff]  ;;  %v123_v3 = vld [vmem:[%s2798_s0 + $0x348] sm:$0xff] }
  0xca   :  { %v1095_v10 = vrot.slane %v694_v4, %v2188_v26  ;;  %543 = vadd.xlane.f32.xlu0 %v542_v59  ;;  %v376_v11 = vpop.xlane.xlu1 %375  ;;  %v271_v59 = vmul.f32 %v2283_v2, %v137_v47 }
  0xcb   :  { %v373_v12 = vpop.xlane.xlu0 %372  ;;  %v697_v22 = vadd.f32 %v2039_v32, %v376_v11  ;;  %v272_v11 = vmul.f32 %v2283_v2, %v138_v63 }
  0xcc   :  { %v1096_v20 = vsel %vm1010_vm12, %v1095_v10, %v1091_v8  ;;  %v696_v23 = vadd.f32 %v2039_v32, %v373_v12  ;;  %v638_v10 = vsel %vm280_vm0, %v271_v59, 0.0  ;;  %v257_v12 = vmul.f32 %v2283_v2, %v123_v3  ;;  %v140_v59 = vld [vmem:[%s2798_s0 + $0x3d0] sm:$0xff] }
  0xcd   :  { %v1101_v28 = vsel %vm1017_vm13, %v1100_v9, %v1096_v20  ;;  %v1110_v29 = vrot.slane %v697_v22, %v2206_v42  ;;  %546 = vadd.xlane.f32.xlu1 %v545_v13  ;;  %v551_v9 = vsel %vm280_vm0, %v242_v0, 0.0  ;;  %v109_v20 = vld [vmem:[%s2798_s0 + $0x2d8] sm:$0xff] }
  0xce   :  { %v1105_v31 = vrot.slane %v696_v23, %v2211_v49  ;;  %633 = vadd.xlane.f32.xlu0 %v632_v14  ;;  %v382_v33 = vpop.xlane.xlu1 %381 }
  0xcf   :  { %v379_v34 = vpop.xlane.xlu0 %378  ;;  %v699_v39 = vadd.f32 %v2039_v32, %v382_v33  ;;  %v258_v33 = vmul.f32 %v2283_v2, %v124_v17 }
  0xd0   :  { %v1106_v25 = vsel %vm1024_vm14, %v1105_v31, %v1101_v28  ;;  %v698_v41 = vadd.f32 %v2039_v32, %v379_v34  ;;  %v596_v31 = vsel %vm280_vm0, %v257_v12, 0.0  ;;  %v243_v34 = vmul.f32 %v2283_v2, %v109_v20 }
  0xd1   :  { %v1111_v50 = vsel %vm1031_vm15, %v1110_v29, %v1106_v25  ;;  %v1119_v53 = vrot.slane %v699_v39, %v2064_v48  ;;  %636 = vadd.xlane.f32.xlu1 %v635_v35  ;;  %v641_v29 = vsel %vm280_vm0, %v272_v11, 0.0  ;;  %v139_v25 = vld [vmem:[%s2798_s0 + $0x3c8] sm:$0xff] }
  0xd2   :  { %v2379_v52 = vsel %vm1586_vm11, %v1111_v50, %v2243_v16  ;;  %v1115_v54 = vrot.slane %v698_v41, %v2055_v43  ;;  %591 = vadd.xlane.f32.xlu0 %v590_v36  ;;  %v388_v55 = vpop.xlane.xlu1 %387  ;;  %vm2803_vm11 = vcmask 786112  }
  0xd3   :  { %v385_v56 = vpop.xlane.xlu0 %384  ;;  %v701_v16 = vadd.f32 %v2039_v32, %v388_v55  ;;  %v244_v55 = vmul.f32 %v2283_v2, %v110_v38 }
  0xd4   :  { %v1120_v30 = vsel %vm933_vm1, %v1119_v53, %v1115_v54  ;;  %v700_v60 = vadd.f32 %v2039_v32, %v385_v56  ;;  %v599_v53 = vsel %vm280_vm0, %v258_v33, 0.0  ;;  %v554_v54 = vsel %vm280_vm0, %v243_v34, 0.0 }
  0xd5   :  { %v1129_v4 = vrot.slane %v701_v16, %v2058_v44  ;;  %594 = vadd.xlane.f32.xlu1 %v593_v57  ;;  %v273_v56 = vmul.f32 %v2283_v2, %v139_v25 }
  0xd6   :  { %v1124_v6 = vrot.slane %v700_v60, %v2069_v51  ;;  %549 = vadd.xlane.f32.xlu0 %v548_v58  ;;  %v394_v7 = vpop.xlane.xlu1 %393 }
  0xd7   :  { %v391_v8 = vpop.xlane.xlu0 %390  ;;  %v703_v14 = vadd.f32 %v2039_v32, %v394_v7  ;;  %v644_v7 = vsel %vm280_vm0, %v273_v56, 0.0 }
  0xd8   :  { %v1125_v13 = vsel %vm940_vm2, %v1124_v6, %v1120_v30  ;;  %v702_v15 = vadd.f32 %v2039_v32, %v391_v8  ;;  %v125_v30 = vld [vmem:[%s2798_s0 + $0x358] sm:$0xff]  ;;  %v557_v6 = vsel %vm280_vm0, %v244_v55, 0.0  ;;  %v274_v8 = vmul.f32 %v2283_v2, %v140_v59 }
  0xd9   :  { %v1130_v22 = vsel %vm947_vm3, %v1129_v4, %v1125_v13  ;;  %v1139_v23 = vrot.slane %v703_v14, %v2083_v61  ;;  %552 = vadd.xlane.f32.xlu1 %v551_v9  ;;  %v259_v9 = vmul.f32 %v2283_v2, %v125_v30  ;;  %v126_v13 = vld [vmem:[%s2798_s0 + $0x360] sm:$0xff]  ;;  %v111_v14 = vld [vmem:[%s2798_s0 + $0x2e8] sm:$0xff] }
  0xda   :  { %v1134_v24 = vrot.slane %v702_v15, %v2086_v62  ;;  %639 = vadd.xlane.f32.xlu0 %v638_v10  ;;  %v400_v27 = vpop.xlane.xlu1 %399 }
  0xdb   :  { %v397_v28 = vpop.xlane.xlu0 %396  ;;  %v705_v36 = vadd.f32 %v2039_v32, %v400_v27  ;;  %v602_v27 = vsel %vm280_vm0, %v259_v9, 0.0 }
  0xdc   :  { %v1135_v35 = vsel %vm954_vm4, %v1134_v24, %v1130_v22  ;;  %v704_v37 = vadd.f32 %v2039_v32, %v397_v28  ;;  %v647_v24 = vsel %vm280_vm0, %v274_v8, 0.0  ;;  %v260_v28 = vmul.f32 %v2283_v2, %v126_v13 }
  0xdd   :  { %v1140_v39 = vsel %vm961_vm5, %v1139_v23, %v1135_v35  ;;  %v1149_v41 = vrot.slane %v705_v36, %v2109_v18  ;;  %642 = vadd.xlane.f32.xlu1 %v641_v29  ;;  %v245_v29 = vmul.f32 %v2283_v2, %v111_v14  ;;  %v112_v35 = vld [vmem:[%s2798_s0 + $0x2f0] sm:$0xff]  ;;  %v141_v36 = vld [vmem:[%s2798_s0 + $0x3d8] sm:$0xff] }
  0xde   :  { %v1144_v45 = vrot.slane %v704_v37, %v2112_v19  ;;  %597 = vadd.xlane.f32.xlu0 %v596_v31  ;;  %v406_v47 = vpop.xlane.xlu1 %405 }
  0xdf   :  { %v403_v50 = vpop.xlane.xlu0 %402  ;;  %v707_v58 = vadd.f32 %v2039_v32, %v406_v47  ;;  %v560_v47 = vsel %vm280_vm0, %v245_v29, 0.0 }
  0xe0   :  { %v1145_v57 = vsel %vm968_vm6, %v1144_v45, %v1140_v39  ;;  %v706_v0 = vadd.f32 %v2039_v32, %v403_v50  ;;  %v605_v45 = vsel %vm280_vm0, %v260_v28, 0.0  ;;  %v246_v50 = vmul.f32 %v2283_v2, %v112_v35 }
  0xe1   :  { %v1150_v16 = vsel %vm975_vm7, %v1149_v41, %v1145_v57  ;;  %v1159_v60 = vrot.slane %v707_v58, %v2134_v40  ;;  %600 = vadd.xlane.f32.xlu1 %v599_v53  ;;  %v275_v53 = vmul.f32 %v2283_v2, %v141_v36  ;;  %v142_v57 = vld [vmem:[%s2798_s0 + $0x3e0] sm:$0xff]  ;;  %v127_v58 = vld [vmem:[%s2798_s0 + $0x368] sm:$0xff] }
  0xe2   :  { %v1154_v63 = vrot.slane %v706_v0, %v2140_v46  ;;  %555 = vadd.xlane.f32.xlu0 %v554_v54  ;;  %v412_v3 = vpop.xlane.xlu1 %411 }
  0xe3   :  { %v409_v4 = vpop.xlane.xlu0 %408  ;;  %v709_v11 = vadd.f32 %v2039_v32, %v412_v3  ;;  %v650_v3 = vsel %vm280_vm0, %v275_v53, 0.0  ;;  %v144_v53 = vld [vmem:[%s2798_s0 + $0x3f0] sm:$0xff] }
  0xe4   :  { %v1155_v10 = vsel %vm982_vm8, %v1154_v63, %v1150_v16  ;;  %v708_v12 = vadd.f32 %v2039_v32, %v409_v4  ;;  %v563_v63 = vsel %vm280_vm0, %v246_v50, 0.0  ;;  %v276_v4 = vmul.f32 %v2283_v2, %v142_v57 }
  0xe5   :  { %v1160_v15 = vsel %vm989_vm9, %v1159_v60, %v1155_v10  ;;  %v1169_v17 = vrot.slane %v709_v11, %v2158_v1  ;;  %558 = vadd.xlane.f32.xlu1 %v557_v6  ;;  %v261_v6 = vmul.f32 %v2283_v2, %v127_v58  ;;  %v128_v10 = vld [vmem:[%s2798_s0 + $0x370] sm:$0xff]  ;;  %v113_v11 = vld [vmem:[%s2798_s0 + $0x2f8] sm:$0xff] }
  0xe6   :  { %v1164_v20 = vrot.slane %v708_v12, %v2164_v5  ;;  %645 = vadd.xlane.f32.xlu0 %v644_v7  ;;  %v418_v22 = vpop.xlane.xlu1 %417 }
  0xe7   :  { %v415_v23 = vpop.xlane.xlu0 %414  ;;  %v711_v33 = vadd.f32 %v2039_v32, %v418_v22  ;;  %v653_v22 = vsel %vm280_vm0, %v276_v4, 0.0 }
  0xe8   :  { %v1165_v31 = vsel %vm996_vm10, %v1164_v20, %v1160_v15  ;;  %v710_v34 = vadd.f32 %v2039_v32, %v415_v23  ;;  %v608_v23 = vsel %vm280_vm0, %v261_v6, 0.0 }
  0xe9   :  { %v1170_v37 = vsel %vm2803_vm11, %v1169_v17, %v1165_v31  ;;  %v1179_v38 = vrot.slane %v711_v33, %v2182_v21  ;;  %648 = vadd.xlane.f32.xlu1 %v647_v24  ;;  %vm1588_vm11 = vcmask 1042434   ;;  %v262_v24 = vmul.f32 %v2283_v2, %v128_v10  ;;  %v129_v31 = vld [vmem:[%s2798_s0 + $0x378] sm:$0xff]  ;;  %v143_v33 = vld [vmem:[%s2798_s0 + $0x3e8] sm:$0xff] }
  0xea   :  { %v1174_v25 = vrot.slane %v710_v34, %v2188_v26  ;;  %603 = vadd.xlane.f32.xlu0 %v602_v27  ;;  %v424_v39 = vpop.xlane.xlu1 %423  ;;  %v247_v27 = vmul.f32 %v2283_v2, %v113_v11 }
  0xeb   :  { %v421_v41 = vpop.xlane.xlu0 %420  ;;  %v713_v55 = vadd.f32 %v2039_v32, %v424_v39  ;;  %v263_v39 = vmul.f32 %v2283_v2, %v129_v31 }
  0xec   :  { %v1175_v54 = vsel %vm1010_vm12, %v1174_v25, %v1170_v37  ;;  %v712_v56 = vadd.f32 %v2039_v32, %v421_v41  ;;  %v566_v25 = vsel %vm280_vm0, %v247_v27, 0.0  ;;  %v277_v41 = vmul.f32 %v2283_v2, %v143_v33 }
  0xed   :  { %v1180_v0 = vsel %vm1017_vm13, %v1179_v38, %v1175_v54  ;;  %v1189_v59 = vrot.slane %v713_v55, %v2206_v42  ;;  %606 = vadd.xlane.f32.xlu1 %v605_v45  ;;  %v611_v38 = vsel %vm280_vm0, %v262_v24, 0.0  ;;  %v145_v54 = vld [vmem:[%s2798_s0 + $0x3f8] sm:$0xff]  ;;  %s1641_s0 = smov [#allocation3]  }
  0xee   :  { %v1184_v30 = vrot.slane %v712_v56, %v2211_v49  ;;  %561 = vadd.xlane.f32.xlu0 %v560_v47  ;;  %v430_v16 = vpop.xlane.xlu1 %429  ;;  %s1608_s24 = sshll.u32 %s1641_s0, 4  ;;  %s1609_s24 = int_to_ptr.vmem [resolvable:$true] %s1608_s24 }
  0xef   :  { %v427_v60 = vpop.xlane.xlu0 %426  ;;  %v715_v8 = vadd.f32 %v2039_v32, %v430_v16  ;;  %v278_v16 = vmul.f32 %v2283_v2, %v144_v53  ;;  %s1619_s25 = scalar_lea.vmem %s1609_s24, 128  ;;  %p1624_p1 = scmp.lt.s32.totalorder %s1609_s24, %s1609_s24 }
  0xf0   :  { %v1185_v7 = vsel %vm1024_vm14, %v1184_v30, %v1180_v0  ;;  %v714_v9 = vadd.f32 %v2039_v32, %v427_v60  ;;  %v656_v30 = vsel %vm280_vm0, %v277_v41, 0.0  ;;  %v279_v60 = vmul.f32 %v2283_v2, %v145_v54  ;;  %p1620_p0 = scmp.ne.s32.totalorder %s1609_s24, %s1619_s25  ;;  %p1625_p2 = scmp.lt.s32.totalorder %s1619_s25, %s1619_s25 }
  0xf1   :  { %v1190_v12 = vsel %vm1031_vm15, %v1189_v59, %v1185_v7  ;;  %v1198_v14 = vrot.slane %v715_v8, %v2064_v48  ;;  %564 = vadd.xlane.f32.xlu1 %v563_v63  ;;  %v614_v59 = vsel %vm280_vm0, %v263_v39, 0.0  ;;  %v659_v11 = vsel %vm280_vm0, %v278_v16, 0.0 }
  0xf2   :  { %v2510_v13 = vsel %vm1588_vm11, %v1190_v12, %v2379_v52  ;;  %v1194_v15 = vrot.slane %v714_v9, %v2055_v43  ;;  %651 = vadd.xlane.f32.xlu0 %v650_v3  ;;  %v436_v17 = vpop.xlane.xlu1 %435  ;;  %v662_v2 = vsel %vm280_vm0, %v279_v60, 0.0  ;;  %vm2804_vm0 = vcmask 786112   ;;  %p1626_p3 = por %p1625_p2, %p1624_p1 }
  0xf3   :  { %v433_v20 = vpop.xlane.xlu0 %432  ;;  %v717_v52 = vadd.f32 %v2039_v32, %v436_v17  ;;  %vm1590_vm11 = vcmask 1043459  }
  0xf4   :  { %v1199_v28 = vsel %vm933_vm1, %v1198_v14, %v1194_v15  ;;  %v716_v29 = vadd.f32 %v2039_v32, %v433_v20  ;;  %p1627_p4 = pnand %p1626_p3, %p1620_p0 }
  0xf5   :  { %v1208_v34 = vrot.slane %v717_v52, %v2058_v44  ;;  %654 = vadd.xlane.f32.xlu1 %v653_v22 }
  0xf6   :  { %v1203_v35 = vrot.slane %v716_v29, %v2069_v51  ;;  %609 = vadd.xlane.f32.xlu0 %v608_v23  ;;  %v442_v36 = vpop.xlane.xlu1 %441 }
  0xf7   :  { %v439_v37 = vpop.xlane.xlu0 %438  ;;  %v719_v47 = vadd.f32 %v2039_v32, %v442_v36 }
  0xf8   :  { %v1204_v45 = vsel %vm940_vm2, %v1203_v35, %v1199_v28  ;;  %v718_v50 = vadd.f32 %v2039_v32, %v439_v37 }
  0xf9   :  { %v1209_v55 = vsel %vm947_vm3, %v1208_v34, %v1204_v45  ;;  %v1218_v56 = vrot.slane %v719_v47, %v2083_v61  ;;  %612 = vadd.xlane.f32.xlu1 %v611_v38 }
  0xfa   :  { %v1213_v57 = vrot.slane %v718_v50, %v2086_v62  ;;  %567 = vadd.xlane.f32.xlu0 %v566_v25  ;;  %v448_v58 = vpop.xlane.xlu1 %447 }
  0xfb   :  { %v445_v0 = vpop.xlane.xlu0 %444  ;;  %v721_v3 = vadd.f32 %v2039_v32, %v448_v58 }
  0xfc   :  { %v1214_v63 = vsel %vm954_vm4, %v1213_v57, %v1209_v55  ;;  %v720_v4 = vadd.f32 %v2039_v32, %v445_v0 }
  0xfd   :  { %v1219_v6 = vsel %vm961_vm5, %v1218_v56, %v1214_v63  ;;  %v1228_v7 = vrot.slane %v721_v3, %v2109_v18  ;;  %615 = vadd.xlane.f32.xlu1 %v614_v59 }
  0xfe   :  { %v1223_v8 = vrot.slane %v720_v4, %v2112_v19  ;;  %657 = vadd.xlane.f32.xlu0 %v656_v30  ;;  %v454_v9 = vpop.xlane.xlu1 %453 }
  0xff   :  { %v451_v10 = vpop.xlane.xlu0 %450  ;;  %v723_v14 = vadd.f32 %v2039_v32, %v454_v9 }
 0x100   :  { %v1224_v12 = vsel %vm968_vm6, %v1223_v8, %v1219_v6  ;;  %v722_v15 = vadd.f32 %v2039_v32, %v451_v10 }
 0x101   :  { %v1229_v17 = vsel %vm975_vm7, %v1228_v7, %v1224_v12  ;;  %v1238_v20 = vrot.slane %v723_v14, %v2134_v40  ;;  %663 = vadd.xlane.f32.xlu1 %v662_v2 }
 0x102   :  { %v1233_v22 = vrot.slane %v722_v15, %v2140_v46  ;;  %660 = vadd.xlane.f32.xlu0 %v659_v11  ;;  %v460_v23 = vpop.xlane.xlu1 %459 }
 0x103   :  { %v457_v24 = vpop.xlane.xlu0 %456  ;;  %v725_v28 = vadd.f32 %v2039_v32, %v460_v23 }
 0x104   :  { %v1234_v27 = vsel %vm982_vm8, %v1233_v22, %v1229_v17  ;;  %v724_v52 = vadd.f32 %v2039_v32, %v457_v24 }
 0x105   :  { %v1239_v29 = vsel %vm989_vm9, %v1238_v20, %v1234_v27  ;;  %v1248_v31 = vrot.slane %v725_v28, %v2158_v1 }
 0x106   :  { %v1243_v33 = vrot.slane %v724_v52, %v2164_v5  ;;  %v466_v34 = vpop.xlane.xlu1 %465 }
 0x107   :  { %v463_v35 = vpop.xlane.xlu0 %462  ;;  %v727_v37 = vadd.f32 %v2039_v32, %v466_v34 }
 0x108   :  { %v1244_v36 = vsel %vm996_vm10, %v1243_v33, %v1239_v29  ;;  %v726_v38 = vadd.f32 %v2039_v32, %v463_v35 }
 0x109   :  { %v1249_v25 = vsel %vm2804_vm0, %v1248_v31, %v1244_v36  ;;  %v1258_v39 = vrot.slane %v727_v37, %v2182_v21 }
 0x10a   :  { %v1253_v41 = vrot.slane %v726_v38, %v2188_v26  ;;  %v472_v45 = vpop.xlane.xlu1 %471 }
 0x10b   :  { %v469_v47 = vpop.xlane.xlu0 %468  ;;  %v729_v53 = vadd.f32 %v2039_v32, %v472_v45 }
 0x10c   :  { %v1254_v50 = vsel %vm1010_vm12, %v1253_v41, %v1249_v25  ;;  %v728_v54 = vadd.f32 %v2039_v32, %v469_v47 }
 0x10d   :  { %v1259_v55 = vsel %vm1017_vm13, %v1258_v39, %v1254_v50  ;;  %v1268_v56 = vrot.slane %v729_v53, %v2206_v42 }
 0x10e   :  { %v1263_v57 = vrot.slane %v728_v54, %v2211_v49  ;;  %v478_v58 = vpop.xlane.xlu1 %477 }
 0x10f   :  { %v475_v0 = vpop.xlane.xlu0 %474  ;;  %v731_v30 = vadd.f32 %v2039_v32, %v478_v58 }
 0x110   :  { %v1264_v59 = vsel %vm1024_vm14, %v1263_v57, %v1259_v55  ;;  %v730_v16 = vadd.f32 %v2039_v32, %v475_v0 }
 0x111   :  { %v1269_v60 = vsel %vm1031_vm15, %v1268_v56, %v1264_v59  ;;  %v1277_v63 = vrot.slane %v731_v30, %v2064_v48 }
 0x112   :  { %v1273_v3 = vrot.slane %v730_v16, %v2055_v43  ;;  %v2588_v4 = vsel %vm1590_vm11, %v1269_v60, %v2510_v13  ;;  %v484_v6 = vpop.xlane.xlu1 %483  ;;  %vm1592_vm11 = vcmask 1044484  }
 0x113   :  { %v481_v7 = vpop.xlane.xlu0 %480  ;;  %v733_v9 = vadd.f32 %v2039_v32, %v484_v6 }
 0x114   :  { %v1278_v8 = vsel %vm933_vm1, %v1277_v63, %v1273_v3  ;;  %v732_v10 = vadd.f32 %v2039_v32, %v481_v7 }
 0x115   :  { %v1287_v11 = vrot.slane %v733_v9, %v2058_v44 }
 0x116   :  { %v1282_v2 = vrot.slane %v732_v10, %v2069_v51  ;;  %v490_v12 = vpop.xlane.xlu1 %489 }
 0x117   :  { %v487_v14 = vpop.xlane.xlu0 %486  ;;  %v735_v17 = vadd.f32 %v2039_v32, %v490_v12 }
 0x118   :  { %v1283_v15 = vsel %vm940_vm2, %v1282_v2, %v1278_v8  ;;  %v734_v13 = vadd.f32 %v2039_v32, %v487_v14 }
 0x119   :  { %v1288_v20 = vsel %vm947_vm3, %v1287_v11, %v1283_v15  ;;  %v1297_v22 = vrot.slane %v735_v17, %v2083_v61 }
 0x11a   :  { %v1292_v23 = vrot.slane %v734_v13, %v2086_v62  ;;  %v496_v24 = vpop.xlane.xlu1 %495 }
 0x11b   :  { %v493_v27 = vpop.xlane.xlu0 %492  ;;  %v737_v52 = vadd.f32 %v2039_v32, %v496_v24 }
 0x11c   :  { %v1293_v28 = vsel %vm954_vm4, %v1292_v23, %v1288_v20  ;;  %v736_v29 = vadd.f32 %v2039_v32, %v493_v27 }
 0x11d   :  { %v1298_v31 = vsel %vm961_vm5, %v1297_v22, %v1293_v28  ;;  %v1307_v33 = vrot.slane %v737_v52, %v2109_v18 }
 0x11e   :  { %v1302_v34 = vrot.slane %v736_v29, %v2112_v19  ;;  %v502_v35 = vpop.xlane.xlu1 %501 }
 0x11f   :  { %v499_v36 = vpop.xlane.xlu0 %498  ;;  %v739_v38 = vadd.f32 %v2039_v32, %v502_v35 }
 0x120   :  { %v1303_v37 = vsel %vm968_vm6, %v1302_v34, %v1298_v31  ;;  %v738_v25 = vadd.f32 %v2039_v32, %v499_v36 }
 0x121   :  { %v1308_v39 = vsel %vm975_vm7, %v1307_v33, %v1303_v37  ;;  %v1317_v41 = vrot.slane %v739_v38, %v2134_v40 }
 0x122   :  { %v1312_v45 = vrot.slane %v738_v25, %v2140_v46  ;;  %v508_v47 = vpop.xlane.xlu1 %507 }
 0x123   :  { %v505_v50 = vpop.xlane.xlu0 %504  ;;  %v741_v54 = vadd.f32 %v2039_v32, %v508_v47 }
 0x124   :  { %v1313_v53 = vsel %vm982_vm8, %v1312_v45, %v1308_v39  ;;  %v740_v55 = vadd.f32 %v2039_v32, %v505_v50 }
 0x125   :  { %v1318_v56 = vsel %vm989_vm9, %v1317_v41, %v1313_v53  ;;  %v1327_v57 = vrot.slane %v741_v54, %v2158_v1 }
 0x126   :  { %v1322_v58 = vrot.slane %v740_v55, %v2164_v5  ;;  %v514_v0 = vpop.xlane.xlu1 %513 }
 0x127   :  { %v511_v59 = vpop.xlane.xlu0 %510  ;;  %v743_v16 = vadd.f32 %v2039_v32, %v514_v0 }
 0x128   :  { %v1323_v30 = vsel %vm996_vm10, %v1322_v58, %v1318_v56  ;;  %v742_v60 = vadd.f32 %v2039_v32, %v511_v59 }
 0x129   :  { %v1328_v63 = vsel %vm2804_vm0, %v1327_v57, %v1323_v30  ;;  %v1337_v3 = vrot.slane %v743_v16, %v2182_v21 }
 0x12a   :  { %v1332_v6 = vrot.slane %v742_v60, %v2188_v26  ;;  %v520_v7 = vpop.xlane.xlu1 %519 }
 0x12b   :  { %v517_v8 = vpop.xlane.xlu0 %516  ;;  %v745_v10 = vadd.f32 %v2039_v32, %v520_v7 }
 0x12c   :  { %v1333_v9 = vsel %vm1010_vm12, %v1332_v6, %v1328_v63  ;;  %v744_v11 = vadd.f32 %v2039_v32, %v517_v8 }
 0x12d   :  { %v1338_v2 = vsel %vm1017_vm13, %v1337_v3, %v1333_v9  ;;  %v1347_v12 = vrot.slane %v745_v10, %v2206_v42 }
 0x12e   :  { %v1342_v14 = vrot.slane %v744_v11, %v2211_v49  ;;  %v526_v15 = vpop.xlane.xlu1 %525 }
 0x12f   :  { %v523_v17 = vpop.xlane.xlu0 %522  ;;  %v747_v20 = vadd.f32 %v2039_v32, %v526_v15 }
 0x130   :  { %v1343_v13 = vsel %vm1024_vm14, %v1342_v14, %v1338_v2  ;;  %v746_v22 = vadd.f32 %v2039_v32, %v523_v17 }
 0x131   :  { %v1348_v23 = vsel %vm1031_vm15, %v1347_v12, %v1343_v13  ;;  %v1356_v24 = vrot.slane %v747_v20, %v2064_v48 }
 0x132   :  { %v1352_v27 = vrot.slane %v746_v22, %v2055_v43  ;;  %v2638_v28 = vsel %vm1592_vm11, %v1348_v23, %v2588_v4  ;;  %v571_v52 = vpop.xlane.xlu1 %570 }
 0x133   :  { %v529_v29 = vpop.xlane.xlu0 %528  ;;  %v762_v34 = vadd.f32 %v2039_v32, %v571_v52 }
 0x134   :  { %v1357_v31 = vsel %vm933_vm1, %v1356_v24, %v1352_v27  ;;  %v748_v33 = vadd.f32 %v2039_v32, %v529_v29 }
 0x135   :  { %v1431_v4 = vrot.slane %v762_v34, %v2055_v43 }
 0x136   :  { %v1361_v35 = vrot.slane %v748_v33, %v2069_v51  ;;  %v532_v36 = vpop.xlane.xlu1 %531 }
 0x137   :  { %v574_v37 = vpop.xlane.xlu0 %573  ;;  %v749_v25 = vadd.f32 %v2039_v32, %v532_v36 }
 0x138   :  { %v1362_v38 = vsel %vm940_vm2, %v1361_v35, %v1357_v31  ;;  %v763_v39 = vadd.f32 %v2039_v32, %v574_v37 }
 0x139   :  { %v1366_v41 = vrot.slane %v749_v25, %v2058_v44 }
 0x13a   :  { %v1435_v45 = vrot.slane %v763_v39, %v2064_v48  ;;  %v619_v47 = vpop.xlane.xlu1 %618 }
 0x13b   :  { %v577_v50 = vpop.xlane.xlu0 %576  ;;  %v1367_v53 = vsel %vm947_vm3, %v1366_v41, %v1362_v38  ;;  %v778_v29 = vadd.f32 %v2039_v32, %v619_v47 }
 0x13c   :  { %v1436_v54 = vsel %vm933_vm1, %v1435_v45, %v1431_v4  ;;  %v764_v55 = vadd.f32 %v2039_v32, %v577_v50 }
 0x13d   :  { %v1510_v41 = vrot.slane %v778_v29, %v2055_v43 }
 0x13e   :  { %v1440_v56 = vrot.slane %v764_v55, %v2069_v51  ;;  %v535_v57 = vpop.xlane.xlu1 %534 }
 0x13f   :  { %v622_v58 = vpop.xlane.xlu0 %621  ;;  %v750_v27 = vadd.f32 %v2039_v32, %v535_v57 }
 0x140   :  { %v1441_v0 = vsel %vm940_vm2, %v1440_v56, %v1436_v54  ;;  %v779_v52 = vadd.f32 %v2039_v32, %v622_v58 }
 0x141   :  { %v1371_v36 = vrot.slane %v750_v27, %v2086_v62 }
 0x142   :  { %v625_v59 = vpop.xlane.xlu1 %624  ;;  %v1514_v37 = vrot.slane %v779_v52, %v2064_v48 }
 0x143   :  { %v580_v30 = vpop.xlane.xlu0 %579  ;;  %v780_v31 = vadd.f32 %v2039_v32, %v625_v59  ;;  %v1372_v57 = vsel %vm954_vm4, %v1371_v36, %v1367_v53 }
 0x144   :  { %v765_v33 = vadd.f32 %v2039_v32, %v580_v30  ;;  %v1515_v58 = vsel %vm933_vm1, %v1514_v37, %v1510_v41  ;;  %vm1594_vm1 = vcmask 1045509  }
 0x145   :  { %v1519_v45 = vrot.slane %v780_v31, %v2069_v51 }
 0x146   :  { %v583_v16 = vpop.xlane.xlu1 %582  ;;  %v1445_v54 = vrot.slane %v765_v33, %v2058_v44 }
 0x147   :  { %v538_v60 = vpop.xlane.xlu0 %537  ;;  %v766_v25 = vadd.f32 %v2039_v32, %v583_v16 }
 0x148   :  { %v751_v38 = vadd.f32 %v2039_v32, %v538_v60 }
 0x149   :  { %v1450_v51 = vrot.slane %v766_v25, %v2086_v62 }
 0x14a   :  { %v541_v63 = vpop.xlane.xlu1 %540  ;;  %v1376_v59 = vrot.slane %v751_v38, %v2083_v61 }
 0x14b   :  { %v628_v3 = vpop.xlane.xlu0 %627  ;;  %v752_v39 = vadd.f32 %v2039_v32, %v541_v63  ;;  %v1520_v63 = vsel %vm940_vm2, %v1519_v45, %v1515_v58  ;;  %vm1596_vm2 = vcmask 1046534  }
 0x14c   :  { %v781_v4 = vadd.f32 %v2039_v32, %v628_v3 }
 0x14d   :  { %v1381_v30 = vrot.slane %v752_v39, %v2112_v19 }
 0x14e   :  { %v631_v6 = vpop.xlane.xlu1 %630  ;;  %v1524_v16 = vrot.slane %v781_v4, %v2058_v44 }
 0x14f   :  { %v586_v7 = vpop.xlane.xlu0 %585  ;;  %v782_v47 = vadd.f32 %v2039_v32, %v631_v6 }
 0x150   :  { %v767_v50 = vadd.f32 %v2039_v32, %v586_v7  ;;  %v1446_v7 = vsel %vm947_vm3, %v1445_v54, %v1441_v0  ;;  %v1525_v33 = vsel %vm947_vm3, %v1524_v16, %v1520_v63  ;;  %vm2805_vm3 = vmmov %vm2804_vm0 }
 0x151   :  { %v1529_v3 = vrot.slane %v782_v47, %v2086_v62 }
 0x152   :  { %v589_v8 = vpop.xlane.xlu1 %588  ;;  %v1455_v53 = vrot.slane %v767_v50, %v2083_v61 }
 0x153   :  { %v544_v9 = vpop.xlane.xlu0 %543  ;;  %v768_v48 = vadd.f32 %v2039_v32, %v589_v8 }
 0x154   :  { %v753_v43 = vadd.f32 %v2039_v32, %v544_v9 }
 0x155   :  { %v1460_v8 = vrot.slane %v768_v48, %v2112_v19 }
 0x156   :  { %v547_v10 = vpop.xlane.xlu1 %546  ;;  %v1386_v29 = vrot.slane %v753_v43, %v2109_v18 }
 0x157   :  { %v634_v11 = vpop.xlane.xlu0 %633  ;;  %v754_v60 = vadd.f32 %v2039_v32, %v547_v10  ;;  %v1377_v10 = vsel %vm961_vm5, %v1376_v59, %v1372_v57 }
 0x158   :  { %v783_v6 = vadd.f32 %v2039_v32, %v634_v11  ;;  %v1451_v11 = vsel %vm954_vm4, %v1450_v51, %v1446_v7  ;;  %v1382_v0 = vsel %vm968_vm6, %v1381_v30, %v1377_v10 }
 0x159   :  { %v1456_v36 = vsel %vm961_vm5, %v1455_v53, %v1451_v11  ;;  %v1387_v45 = vsel %vm975_vm7, %v1386_v29, %v1382_v0 }
 0x15a   :  { %v637_v2 = vpop.xlane.xlu1 %636  ;;  %v1534_v37 = vrot.slane %v783_v6, %v2083_v61 }
 0x15b   :  { %v592_v12 = vpop.xlane.xlu0 %591  ;;  %v784_v9 = vadd.f32 %v2039_v32, %v637_v2  ;;  %v1391_v2 = vrot.slane %v754_v60, %v2140_v46 }
 0x15c   :  { %v769_v27 = vadd.f32 %v2039_v32, %v592_v12  ;;  %v1530_v12 = vsel %vm954_vm4, %v1529_v3, %v1525_v33  ;;  %vm2806_vm4 = vmmov %vm2804_vm0 }
 0x15d   :  { %v1535_v48 = vsel %vm961_vm5, %v1534_v37, %v1530_v12  ;;  %vm2807_vm5 = vmmov %vm2804_vm0 }
 0x15e   :  { %v595_v14 = vpop.xlane.xlu1 %594  ;;  %v1465_v25 = vrot.slane %v769_v27, %v2109_v18 }
 0x15f   :  { %v550_v15 = vpop.xlane.xlu0 %549  ;;  %v770_v62 = vadd.f32 %v2039_v32, %v595_v14  ;;  %v1461_v14 = vsel %vm968_vm6, %v1460_v8, %v1456_v36 }
 0x160   :  { %v755_v31 = vadd.f32 %v2039_v32, %v550_v15  ;;  %v1539_v15 = vrot.slane %v784_v9, %v2112_v19  ;;  %v1466_v43 = vsel %vm975_vm7, %v1465_v25, %v1461_v14 }
 0x161   :  { %v1470_v47 = vrot.slane %v770_v62, %v2140_v46 }
 0x162   :  { %v553_v17 = vpop.xlane.xlu1 %552  ;;  %v1396_v50 = vrot.slane %v755_v31, %v2134_v40 }
 0x163   :  { %v2655_v13 = vpop.xlane.xlu0 %639  ;;  %v756_v38 = vadd.f32 %v2039_v32, %v553_v17  ;;  %v1392_v17 = vsel %vm982_vm8, %v1391_v2, %v1387_v45  ;;  %v1471_v30 = vsel %vm982_vm8, %v1470_v47, %v1466_v43 }
 0x164   :  { %v785_v54 = vadd.f32 %v2039_v32, %v2655_v13  ;;  %v1397_v16 = vsel %vm989_vm9, %v1396_v50, %v1392_v17 }
 0x165   :  { %v1401_v57 = vrot.slane %v756_v38, %v2164_v5 }
 0x166   :  { %v2657_v20 = vpop.xlane.xlu1 %642  ;;  %v1544_v63 = vrot.slane %v785_v54, %v2109_v18 }
 0x167   :  { %v598_v22 = vpop.xlane.xlu0 %597  ;;  %v786_v58 = vadd.f32 %v2039_v32, %v2657_v20  ;;  %v1402_v7 = vsel %vm996_vm10, %v1401_v57, %v1397_v16 }
 0x168   :  { %v771_v39 = vadd.f32 %v2039_v32, %v598_v22 }
 0x169   :  { %v1549_v8 = vrot.slane %v786_v58, %v2140_v46 }
 0x16a   :  { %v2659_v23 = vpop.xlane.xlu1 %600  ;;  %v1475_v13 = vrot.slane %v771_v39, %v2134_v40 }
 0x16b   :  { %v556_v24 = vpop.xlane.xlu0 %555  ;;  %v772_v19 = vadd.f32 %v2039_v32, %v2659_v23 }
 0x16c   :  { %v757_v61 = vadd.f32 %v2039_v32, %v556_v24  ;;  %v1540_v24 = vsel %vm968_vm6, %v1539_v15, %v1535_v48  ;;  %vm1598_vm6 = vcmask 1047559  }
 0x16d   :  { %v1480_v3 = vrot.slane %v772_v19, %v2164_v5 }
 0x16e   :  { %v559_v34 = vpop.xlane.xlu1 %558  ;;  %v1406_v60 = vrot.slane %v757_v61, %v2158_v1  ;;  %v1545_v61 = vsel %vm975_vm7, %v1544_v63, %v1540_v24 }
 0x16f   :  { %v2666_v35 = vpop.xlane.xlu0 %645  ;;  %v758_v22 = vadd.f32 %v2039_v32, %v559_v34  ;;  %v1550_v54 = vsel %vm982_vm8, %v1549_v8, %v1545_v61 }
 0x170   :  { %v787_v18 = vadd.f32 %v2039_v32, %v2666_v35  ;;  %v1407_v62 = vsel %vm2805_vm3, %v1406_v60, %v1402_v7 }
 0x171   :  { %v1411_v53 = vrot.slane %v758_v22, %v2188_v26 }
 0x172   :  { %v2680_v55 = vpop.xlane.xlu1 %648  ;;  %v1554_v38 = vrot.slane %v787_v18, %v2134_v40 }
 0x173   :  { %v604_v56 = vpop.xlane.xlu0 %603  ;;  %v1412_v33 = vsel %vm1010_vm12, %v1411_v53, %v1407_v62 }
 0x174   :  { %v773_v20 = vadd.f32 %v2039_v32, %v604_v56  ;;  %v788_v56 = vadd.f32 %v2039_v32, %v2680_v55  ;;  %v1555_v57 = vsel %vm989_vm9, %v1554_v38, %v1550_v54 }
 0x176   :  { %v607_v52 = vpop.xlane.xlu1 %606  ;;  %v1485_v46 = vrot.slane %v773_v20, %v2158_v1  ;;  %v1559_v14 = vrot.slane %v788_v56, %v2164_v5 }
 0x177   :  { %v562_v44 = vpop.xlane.xlu0 %561  ;;  %v774_v6 = vadd.f32 %v2039_v32, %v607_v52 }
 0x178   :  { %v759_v59 = vadd.f32 %v2039_v32, %v562_v44  ;;  %v1476_v44 = vsel %vm989_vm9, %v1475_v13, %v1471_v30 }
 0x179   :  { %v1481_v0 = vsel %vm996_vm10, %v1480_v3, %v1476_v44  ;;  %v1490_v35 = vrot.slane %v774_v6, %v2188_v26 }
 0x17a   :  { %v565_v4 = vpop.xlane.xlu1 %564  ;;  %v1416_v9 = vrot.slane %v759_v59, %v2182_v21 }
 0x17b   :  { %v652_v41 = vpop.xlane.xlu0 %651  ;;  %v760_v23 = vadd.f32 %v2039_v32, %v565_v4 }
 0x17c   :  { %v789_v55 = vadd.f32 %v2039_v32, %v652_v41  ;;  %v1417_v2 = vsel %vm1017_vm13, %v1416_v9, %v1412_v33  ;;  %v1486_v41 = vsel %vm2806_vm4, %v1485_v46, %v1481_v0 }
 0x17d   :  { %v1421_v10 = vrot.slane %v760_v23, %v2211_v49  ;;  %v1491_v40 = vsel %vm1010_vm12, %v1490_v35, %v1486_v41 }
 0x17e   :  { %v655_v51 = vpop.xlane.xlu1 %654  ;;  %v1564_v5 = vrot.slane %v789_v55, %v2158_v1  ;;  %v1560_v1 = vsel %vm996_vm10, %v1559_v14, %v1555_v57 }
 0x17f   :  { %v610_v34 = vpop.xlane.xlu0 %609  ;;  %v790_v12 = vadd.f32 %v2039_v32, %v655_v51  ;;  %v1422_v15 = vsel %vm1024_vm14, %v1421_v10, %v1417_v2 }
 0x180   :  { %v775_v27 = vadd.f32 %v2039_v32, %v610_v34  ;;  %v1565_v23 = vsel %vm2807_vm5, %v1564_v5, %v1560_v1 }
 0x181   :  { %v1569_v19 = vrot.slane %v790_v12, %v2188_v26 }
 0x182   :  { %v613_v52 = vpop.xlane.xlu1 %612  ;;  %v1495_v36 = vrot.slane %v775_v27, %v2182_v21 }
 0x183   :  { %v568_v29 = vpop.xlane.xlu0 %567  ;;  %v776_v31 = vadd.f32 %v2039_v32, %v613_v52  ;;  %v1570_v34 = vsel %vm1010_vm12, %v1569_v19, %v1565_v23 }
 0x184   :  { %v761_v11 = vadd.f32 %v2039_v32, %v568_v29  ;;  %v1496_v22 = vsel %vm1017_vm13, %v1495_v36, %v1491_v40 }
 0x185   :  { %v1500_v25 = vrot.slane %v776_v31, %v2211_v49 }
 0x186   :  { %v1426_v37 = vrot.slane %v761_v11, %v2206_v42  ;;  %v616_v39 = vpop.xlane.xlu1 %615 }
 0x187   :  { %v658_v4 = vpop.xlane.xlu0 %657  ;;  %v777_v47 = vadd.f32 %v2039_v32, %v616_v39  ;;  %v1501_v58 = vsel %vm1024_vm14, %v1500_v25, %v1496_v22 }
 0x188   :  { %v1427_v45 = vsel %vm1031_vm15, %v1426_v37, %v1422_v15  ;;  %v791_v50 = vadd.f32 %v2039_v32, %v658_v4 }
 0x189   :  { %v1595_v17 = vsel %vm1594_vm1, %v1427_v45, %v2638_v28  ;;  %v1505_v48 = vrot.slane %v777_v47, %v2206_v42 }
 0x18a   :  { %v1574_v59 = vrot.slane %v791_v50, %v2182_v21  ;;  %v664_v43 = vpop.xlane.xlu1 %663 }
 0x18b   :  { %v661_v24 = vpop.xlane.xlu0 %660  ;;  %v793_v13 = vadd.f32 %v2039_v32, %v664_v43  ;;  %v1506_v26 = vsel %vm1031_vm15, %v1505_v48, %v1501_v58 }
 0x18c   :  { %v792_v28 = vadd.f32 %v2039_v32, %v661_v24  ;;  %v1597_v51 = vsel %vm1596_vm2, %v1506_v26, %v1595_v17  ;;  %v1575_v16 = vsel %vm1017_vm13, %v1574_v59, %v1570_v34 }
 0x18d   :  { %v1584_v21 = vrot.slane %v793_v13, %v2206_v42 }
 0x18e   :  { %v1579_v30 = vrot.slane %v792_v28, %v2211_v49 }
 0x190   :  { %v1580_v60 = vsel %vm1024_vm14, %v1579_v30, %v1575_v16 }
 0x191   :  { %v1585_v32 = vsel %vm1031_vm15, %v1584_v21, %v1580_v60 }
 0x192   :  { %v1599_v20 = vsel %vm1598_vm6, %v1585_v32, %v1597_v51 }
 0x193   :  { %1601 = vst [vmem:[#allocation3] sm:$0xff] %v1599_v20 }
 0x194   :  { %1630 = shalt.err (!%p1627_p4)
}
 0x195   :  { %1611 = dma.vmem_to_hbm [thread:$0]  %s1609_s24, 128, %s2801_s3, [#allocation4]  }
 0x196   :  { %1639 = dma.done.wait [#allocation4], 128  }
 0x197   :  { %1640 = vsyncadd [#allocation4], 4294967168 }
 0x198   :  { %1615 = vsyncpa [#allocation4], 1 }

</bundles_post_ra>
